<compile_context>
chip_gen: v7x
topology: tpu7x:2x2x1
jax: 0.10.0
libtpu: 0.0.40
codegen_flags: <defaults>
</compile_context>

<pallas_src>
import functools

import jax
import jax.numpy as jnp
from jax import lax
from jax.experimental import pallas as pl
from jax.experimental.pallas import tpu as pltpu


def _vmem_capacity_bytes():
    """VMEM capacity of the current chip; conservative fallback if unavailable."""
    try:
        info = pltpu.get_tpu_info()
        cap = getattr(info, "vmem_capacity_bytes", None)
        if cap:
            return int(cap)
    except Exception:
        pass
    return 64 * 1024 * 1024  # v7x-sized (smallest of the three generations)


def _scgm_kernel(t_ref, v_ref, o_ref, *, mode, c_total, needs_c_mask):
    """One grid step.

    t_ref: (bt, 1, tc)   mean-over-L text features (c chunk on lanes)
    v_ref: (bt, tc, hw)  flattened vision features (hw on lanes)
    o_ref: (bt, 1, hw)   f32; running sum over c chunks, normalized on the
                         last c step (resident across the 'arbitrary' k axis).
    """
    k = pl.program_id(1)

    @pl.when(k == 0)
    def _():
        o_ref[...] = jnp.zeros_like(o_ref)

    t = t_ref[...]                      # (bt, 1, tc)
    v = v_ref[...]                      # (bt, tc, hw)

    if needs_c_mask:
        # Tail c-chunk overruns the real channel count: zero the out-of-bounds
        # region of BOTH operands (OOB block reads may contain garbage/NaN).
        tc = v_ref.shape[1]
        base = k * tc
        c_v = base + lax.broadcasted_iota(jnp.int32, (1, tc, 1), 1)
        v = jnp.where(c_v < c_total, v, 0)
        c_t = base + lax.broadcasted_iota(jnp.int32, (1, 1, tc), 2)
        t = jnp.where(c_t < c_total, t, 0)

    # Batched matvec on the MXU: (bt,1,tc) x (bt,tc,hw) -> (bt,1,hw), f32 acc.
    o_ref[...] += lax.dot_general(
        t, v,
        dimension_numbers=(((2,), (1,)), ((0,), (0,))),
        preferred_element_type=jnp.float32,
        precision=lax.Precision.HIGHEST,
    )

    @pl.when(k == pl.num_programs(1) - 1)
    def _():
        sim = o_ref[...]                                  # (bt, 1, hw) f32
        mx = jnp.max(sim, axis=-1, keepdims=True)         # (bt, 1, 1)
        mn = jnp.min(sim, axis=-1, keepdims=True)
        # Faithful to PyTorch: no epsilon (a constant row yields inf/nan).
        inv = pl.reciprocal(mx - mn, approx=False)
        if mode == '-11':
            o_ref[...] = (sim - mn) * (2.0 * inv) - 1.0   # affine folded in
        else:
            o_ref[...] = (sim - mn) * inv


def scgm_forward(vision_feature, text_feature, mode='01', *,
                 batch_block=None, c_block=None, vmem_budget_bytes=None):
    """Pallas implementation of SCGM.forward.

    vision_feature: (b, c, h, w)   -- streamed in its NATIVE dtype (no pre-cast)
    text_feature:   (b, L, c)
    returns:        (b, h, w) float32

    Note: the mean over L is folded into the text operand before the
    contraction (same math, FP reassociated).
    """
    assert mode in ('01', '-11')
    b, c, h, w = vision_feature.shape
    hw = h * w

    # Fold the mean over L into the text operand (tiny; b*c elements).
    t_mean = jnp.mean(text_feature.astype(jnp.float32), axis=1)       # (b, c)
    t_mean = t_mean.astype(vision_feature.dtype).reshape(b, 1, c)      # (b,1,c)

    # Free reshape (metadata only): no HBM copy of the dominant tensor.
    vis = vision_feature.reshape(b, c, hw)                             # (b,c,hw)
    itemsize = jnp.dtype(vis.dtype).itemsize

    vmem_cap = _vmem_capacity_bytes()
    # ~8 MiB/buffer on v7x (64 MiB VMEM), ~16 MiB on v5e/v6e (128 MiB VMEM).
    budget = (int(vmem_budget_bytes) if vmem_budget_bytes is not None
              else max(2 << 20, vmem_cap // 8))

    # --- Batch blocking: >= 2 blocks on the 'parallel' axis whenever b >= 2
    #     (both v7x TensorCores stream); bt is a leading block dim, so it has
    #     no (8,128) granularity constraint.
    if batch_block is None:
        bt = 1 if b <= 1 else min(8, -(-b // 2))
    else:
        bt = int(batch_block)
    bt = max(1, min(bt, b))

    # --- c blocking: keep the streamed (bt, tc, hw) vision tile near the
    #     budget. tc sits on the lane dim of the text block, so when tiling it
    #     must be a multiple of 128 (or equal c).
    def _fits(bt_, tc_):
        return bt_ * tc_ * hw * itemsize <= budget

    if c_block is None:
        if _fits(bt, c):
            tc = c
        else:
            if batch_block is None:
                while bt > 1 and not _fits(bt, min(c, 128)):
                    bt = max(1, bt // 2)
            if c <= 128:
                tc = c
            else:
                tc = (budget // max(1, bt * hw * itemsize)) // 128 * 128
                tc = int(min(c, max(128, tc)))
    else:
        tc = min(int(c_block), c)
    assert tc == c or tc % 128 == 0, "c_block must equal c or be a multiple of 128"

    nb = -(-b // bt)
    nc = -(-c // tc)
    needs_c_mask = (nc * tc) != c        # tail c-chunk overruns the array

    # VMEM usage: double-buffered vision + text + resident output (sublane pad).
    vis_tile = bt * tc * hw * itemsize
    t_tile = bt * 8 * tc * itemsize
    out_tile = bt * 8 * hw * 4
    usage = 2 * vis_tile + 2 * t_tile + 2 * out_tile + (4 << 20)
    vmem_limit = int(min(max(32 << 20, usage), vmem_cap * 3 // 4))

    kernel = functools.partial(_scgm_kernel, mode=mode, c_total=c,
                               needs_c_mask=needs_c_mask)

    out = pl.pallas_call(
        kernel,
        out_shape=jax.ShapeDtypeStruct((b, 1, hw), jnp.float32),
        grid_spec=pltpu.PrefetchScalarGridSpec(
            num_scalar_prefetch=0,
            grid=(nb, nc),
            in_specs=[
                pl.BlockSpec((bt, 1, tc), lambda i, k: (i, 0, k)),
                pl.BlockSpec((bt, tc, hw), lambda i, k: (i, k, 0)),
            ],
            out_specs=pl.BlockSpec((bt, 1, hw), lambda i, k: (i, 0, 0)),
        ),
        compiler_params=pltpu.CompilerParams(
            dimension_semantics=("parallel", "arbitrary"),
            vmem_limit_bytes=vmem_limit,
        ),
    )(t_mean, vis)

    return out.reshape(b, h, w)


def _scgm_ref(vision_feature, text_feature, mode='01'):
    """Pure-JAX reference mirroring the PyTorch code."""
    b, c, h, w = vision_feature.shape
    vf = vision_feature.reshape(b, c, -1)
    sim = jnp.einsum('blc,bcn->bln', text_feature, vf,
                     precision=lax.Precision.HIGHEST)
    sim = sim.mean(axis=1)
    mx = sim.max(axis=1, keepdims=True)
    mn = sim.min(axis=1, keepdims=True)
    sim = (sim - mn) / (mx - mn)
    if mode == '-11':
        sim = sim * 2.0 - 1.0
    return sim.reshape(b, h, w)


if __name__ == "__main__":
    # SCGM has no learnable parameters; only the `mode` hyperparameter.
    # c = 256 matches GroundingDINO's feature dim; everything stays small.
    b, c, h, w, L = 2, 256, 16, 16, 8

    key = jax.random.PRNGKey(0)
    k1, k2, k3, k4 = jax.random.split(key, 4)
    vision_feature = jax.random.normal(k1, (b, c, h, w), dtype=jnp.float32)
    text_feature = jax.random.normal(k2, (b, L, c), dtype=jnp.float32)

    out = jax.block_until_ready(scgm_forward(vision_feature, text_feature, mode='01'))
    ref = _scgm_ref(vision_feature, text_feature, mode='01')
    assert out.shape == (b, h, w)
    assert jnp.allclose(out, ref, atol=2e-3, rtol=2e-3)

    # '-11' mode.
    out2 = jax.block_until_ready(scgm_forward(vision_feature, text_feature, mode='-11'))
    ref2 = _scgm_ref(vision_feature, text_feature, mode='-11')
    assert jnp.allclose(out2, ref2, atol=2e-3, rtol=2e-3)

    # Ragged channels (masked tail c-chunk) + ragged batch tail + explicit blocking.
    b3, c3, L3 = 3, 300, 4
    vf3 = jax.random.normal(k3, (b3, c3, h, w), dtype=jnp.float32)
    tf3 = jax.random.normal(k4, (b3, L3, c3), dtype=jnp.float32)
    out3 = jax.block_until_ready(
        scgm_forward(vf3, tf3, mode='-11', batch_block=2, c_block=128))
    ref3 = _scgm_ref(vf3, tf3, mode='-11')
    assert out3.shape == (b3, h, w)
    assert jnp.allclose(out3, ref3, atol=2e-3, rtol=2e-3)

    # b == 1 (single parallel block) still compiles and matches.
    # TODO(synk): for b == 1 on v7x only one TensorCore streams; an hw-split
    # partial-sum variant with an XLA normalize epilogue would recover it.
    out4 = jax.block_until_ready(scgm_forward(vision_feature[:1], text_feature[:1], mode='01'))
    ref4 = _scgm_ref(vision_feature[:1], text_feature[:1], mode='01')
    assert jnp.allclose(out4, ref4, atol=2e-3, rtol=2e-3)

    print("KERNEL_OK")
</pallas_src>

<mosaic_0001>
module attributes {stable_mosaic.version = 11 : i64} {
  func.func @_scgm_kernel(%arg0: i32, %arg1: i32, %arg2: memref<1x1x256xf32, #tpu.memory_space<vmem>>, %arg3: memref<1x256x256xf32, #tpu.memory_space<vmem>>, %arg4: memref<1x1x256xf32, #tpu.memory_space<vmem>>) attributes {dimension_semantics = [#tpu.dimension_semantics<parallel>, #tpu.dimension_semantics<arbitrary>], iteration_bounds = array<i64: 2, 1>, scalar_prefetch = 0 : i64, scratch_operands = 0 : i64, tpu.core_type = #tpu.core_type<tc>, window_params = [{transform_indices = @transform_0, window_bounds = array<i64: 1, 1, 256>}, {transform_indices = @transform_1, window_bounds = array<i64: 1, 256, 256>}, {transform_indices = @transform_2, window_bounds = array<i64: 1, 1, 256>}]} {
    %c0_i32 = arith.constant 0 : i32
    %0 = arith.cmpi eq, %arg1, %c0_i32 : i32
    %1 = arith.extui %0 : i1 to i32
    %c0_i32_0 = arith.constant 0 : i32
    %2 = arith.cmpi ne, %1, %c0_i32_0 : i32
    scf.if %2 {
      %cst_14 = arith.constant 0.000000e+00 : f32
      %12 = vector.broadcast %cst_14 : f32 to vector<1x1x256xf32>
      %c0_15 = arith.constant 0 : index
      %c0_16 = arith.constant 0 : index
      %c0_17 = arith.constant 0 : index
      %13 = vector.load %arg4[%c0_15, %c0_16, %c0_17] : memref<1x1x256xf32, #tpu.memory_space<vmem>>, vector<1x1x256xf32>
      tpu.vector_store %arg4[%c0_15, %c0_16, %c0_17], %12 {strides = array<i32>} : memref<1x1x256xf32, #tpu.memory_space<vmem>>, vector<1x1x256xf32>,
    } else {
    }
    %c0 = arith.constant 0 : index
    %c0_1 = arith.constant 0 : index
    %c0_2 = arith.constant 0 : index
    %3 = vector.load %arg2[%c0, %c0_1, %c0_2] : memref<1x1x256xf32, #tpu.memory_space<vmem>>, vector<1x1x256xf32>
    %c0_3 = arith.constant 0 : index
    %c0_4 = arith.constant 0 : index
    %c0_5 = arith.constant 0 : index
    %4 = vector.load %arg3[%c0_3, %c0_4, %c0_5] : memref<1x256x256xf32, #tpu.memory_space<vmem>>, vector<1x256x256xf32>
    %c0_6 = arith.constant 0 : index
    %c0_7 = arith.constant 0 : index
    %c0_8 = arith.constant 0 : index
    %5 = vector.load %arg4[%c0_6, %c0_7, %c0_8] : memref<1x1x256xf32, #tpu.memory_space<vmem>>, vector<1x1x256xf32>
    %cst = arith.constant dense<0.000000e+00> : vector<1x1x256xf32>
    %6 = tpu.matmul %3, %4, %cst {dimension_numbers = #tpu.dot_dimension_numbers<[2], [1], [1], [2], [0, 0, 0, 1, 1, 2], [0], [0]>, precision = #tpu.contract_precision<fp32>} : vector<1x1x256xf32>, vector<1x256x256xf32>, vector<1x1x256xf32> -> vector<1x1x256xf32>
    %7 = arith.addf %5, %6 : vector<1x1x256xf32>
    %c0_9 = arith.constant 0 : index
    %c0_10 = arith.constant 0 : index
    %c0_11 = arith.constant 0 : index
    %8 = vector.load %arg4[%c0_9, %c0_10, %c0_11] : memref<1x1x256xf32, #tpu.memory_space<vmem>>, vector<1x1x256xf32>
    tpu.vector_store %arg4[%c0_9, %c0_10, %c0_11], %7 {strides = array<i32>} : memref<1x1x256xf32, #tpu.memory_space<vmem>>, vector<1x1x256xf32>,
    %c0_i32_12 = arith.constant 0 : i32
    %9 = arith.cmpi eq, %arg1, %c0_i32_12 : i32
    %10 = arith.extui %9 : i1 to i32
    %c0_i32_13 = arith.constant 0 : i32
    %11 = arith.cmpi ne, %10, %c0_i32_13 : i32
    scf.if %11 {
      %c0_14 = arith.constant 0 : index
      %c0_15 = arith.constant 0 : index
      %c0_16 = arith.constant 0 : index
      %12 = vector.load %arg4[%c0_14, %c0_15, %c0_16] : memref<1x1x256xf32, #tpu.memory_space<vmem>>, vector<1x1x256xf32>
      %cst_17 = arith.constant dense<0xFF800000> : vector<1x1xf32>
      %13 = vector.multi_reduction <maximumf>, %12, %cst_17 [2] : vector<1x1x256xf32> to vector<1x1xf32>
      %14 = vector.shape_cast %13 : vector<1x1xf32> to vector<1x1x1xf32>
      %cst_18 = arith.constant dense<0x7F800000> : vector<1x1xf32>
      %15 = vector.multi_reduction <minimumf>, %12, %cst_18 [2] : vector<1x1x256xf32> to vector<1x1xf32>
      %16 = vector.shape_cast %15 : vector<1x1xf32> to vector<1x1x1xf32>
      %17 = arith.subf %14, %16 : vector<1x1x1xf32>
      %18 = tpu.reciprocal %17 : vector<1x1x1xf32> -> vector<1x1x1xf32>
      %19 = vector.broadcast %16 : vector<1x1x1xf32> to vector<1x1x256xf32>
      %20 = arith.subf %12, %19 : vector<1x1x256xf32>
      %21 = vector.broadcast %18 : vector<1x1x1xf32> to vector<1x1x256xf32>
      %22 = arith.mulf %20, %21 : vector<1x1x256xf32>
      %c0_19 = arith.constant 0 : index
      %c0_20 = arith.constant 0 : index
      %c0_21 = arith.constant 0 : index
      %23 = vector.load %arg4[%c0_19, %c0_20, %c0_21] : memref<1x1x256xf32, #tpu.memory_space<vmem>>, vector<1x1x256xf32>
      tpu.vector_store %arg4[%c0_19, %c0_20, %c0_21], %22 {strides = array<i32>} : memref<1x1x256xf32, #tpu.memory_space<vmem>>, vector<1x1x256xf32>,
    } else {
    }
    return
  }
  func.func @transform_0(%arg0: i32, %arg1: i32) -> (i32, i32, i32) {
    %c0_i32 = arith.constant 0 : i32
    %c0_i32_0 = arith.constant 0 : i32
    return %arg0, %c0_i32, %arg1 : i32, i32, i32
  }
  func.func @transform_1(%arg0: i32, %arg1: i32) -> (i32, i32, i32) {
    %c0_i32 = arith.constant 0 : i32
    %c0_i32_0 = arith.constant 0 : i32
    return %arg0, %arg1, %c0_i32 : i32, i32, i32
  }
  func.func @transform_2(%arg0: i32, %arg1: i32) -> (i32, i32, i32) {
    %c0_i32 = arith.constant 0 : i32
    %c0_i32_0 = arith.constant 0 : i32
    %c0_i32_1 = arith.constant 0 : i32
    return %arg0, %c0_i32, %c0_i32_0 : i32, i32, i32
  }
}

</mosaic_0001>

<bundles_post_ra>
// kernel: tpu_custom_call.1
= control target key start
LH: loop header
LB: loop body
LE: loop exit
PB: predicated region body
PF: predicated region fallthrough
CT: control target
= control target key end

     0   :  { %7 = vsyncpa [#allocation3], 0  ;;  %s3497_s0 = inlined_call_operand.hbm [shape: f32[2,1,256], index: 0, kind: input, shape index: {}]   ;;  %s3498_s1 = inlined_call_operand.hbm [shape: f32[2,256,256], index: 1, kind: input, shape index: {}]   ;;  %s3499_s2 = inlined_call_operand.hbm [shape: f32[2,1,256], index: 2, kind: output, shape index: {}]  }
   0x1   :  { %9 = vsyncpa [#allocation3 + $0x1], 0 }
   0x2   :  { %10 = vsyncpa [#allocation6], 0 }
   0x3   :  { %12 = vsyncpa [#allocation6 + $0x1], 0 }
   0x4   :  { %13 = vsyncpa [#allocation4], 0 }
   0x5   :  { %15 = vsyncpa [#allocation4 + $0x1], 0  ;;  %s2441_s9 = smov 0   ;;  %s2443_s10 = smov 0  }
   0x6   :  { %s2445_s11 = smov 0   ;;  %s2447_s12 = smov 0  }
   0x7   :  { %s2449_s13 = smov 0   ;;  %s2451_s14 = smov 0  }
   0x8 LB: > { %s1782_s15 = sadd.s32 4294967295, %s2417_s14   ;;  %s1783_s16 = sadd.s32 4294967294, %s2417_s14   ;;  %s2417_s14 = sphi %s2451_s14, %s21_s14   ;;  %s2413_s13 = sphi %s2449_s13, %s3929_s13   ;;  %s2409_s12 = sphi %s2447_s12, %s3928_s12   ;;  %s2405_s11 = sphi %s2445_s11, %s3927_s11   ;;  %s2401_s10 = sphi %s2443_s10, %s3926_s10   ;;  %s2397_s9 = sphi %s2441_s9, %s3925_s9  }
   0x9   : > { %s33_s17 = sadd.s32 1, %s2413_s13  ;;  %s42_s18 = sadd.s32 1, %s2405_s11 }
   0xa   : > { %p35_p0 = scmp.ge.s32.totalorder %s33_s17, 2  ;;  %p49_p1 = scmp.ne.s32.totalorder %s2405_s11, %s2401_s10 }
   0xb   : > { %p50_p2 = scmp.eq.s32.totalorder %s2417_s14, 0  ;;  %p55_p3 = scmp.ne.s32.totalorder %s2401_s10, %s2397_s9 }
   0xc   : > { %s3931_s17 = smov (%p35_p0, %s33_s17), 0  ;;  %p56_p5 = scmp.eq.s32.totalorder %s1782_s15, 0 }
   0xd   : > { %p2482_p4 = por %p50_p2, %p49_p1  ;;  %s37_s20 = ssub.s32 %s2413_s13, %s3931_s17 }
   0xe   : > { %p107_p6 = scmp.eq.s32.totalorder %s1782_s15, 1  ;;  %p40_p7 = scmp.eq.s32.totalorder %s37_s20, 0 }
   0xf   : > { %p2488_p8 = por %p56_p5, %p55_p3  ;;  %p113_p10 = scmp.eq.s32.totalorder %s1783_s16, 1 }
  0x10   : > { %p2492_p9 = por %p107_p6, %p49_p1  ;;  %p2215_p13 = scmp.lt.s32.totalorder %s2417_s14, 2 }
  0x11   : > { %s3646_s21 = scalar_select %p2488_p8, 1, 0 }
  0x12   : > { %s3647_s22 = scalar_select %p2492_p9, 1, 0 }
  0x13   : > { %s2497_s23 = scalar_select %p40_p7, %s2405_s11, %s42_s18  }
  0x14   : > { %p2499_p11 = por %p113_p10, %p55_p3  ;;  %s2506_s25 = sand.u32 1, %s2405_s11  }
  0x15   : > { %s1786_s26 = sshll.u32 %s2506_s25, 1  ;;  %s1801_s27 = sshll.u32 %s2413_s13, 5 }
  0x16   : > { %s3648_s24 = scalar_select %p2499_p11, 1, 0 }
  0x17   : > { %s2513_s30 = scalar_lea.hbm %s3497_s0, %s1801_s27  ;;  %s137_s3 = scalar_lea.vmem [#allocation2], %s1786_s26 }
  0x18   : > { %s147_s4 = sshll.u32 %s137_s3, 4  ;;  %p2519_p0 = pnand %p2215_p13, %p2482_p4  ;;  %s2515_s4 = int_to_ptr.vmem [resolvable:$true] %s147_s4 }
  0x19   : > { %s134_s6 = scalar_lea.sflag [#allocation3], %s2506_s25  ;;  %s2271_s7 = scalar_lea.hbm %s2513_s30, 32 }
  0x1a   : > { %p2272_p3 = scmp.ne.s32.totalorder %s2513_s30, %s2271_s7  ;;  %p2273_p5 = pneg %p2519_p0 }
  0x1b   : > { %s2276_s16 = scalar_lea.hbm %s3497_s0, 64  ;;  %p2277_p4 = scmp.lt.u32.totalorder %s2513_s30, %s3497_s0 }
  0x1c   : > { %p2274_p6 = pnand %p2273_p5, %p2272_p3  ;;  %p2278_p10 = scmp.lt.u32.totalorder %s2276_s16, %s2271_s7 }
  0x1d   : > { %p2280_p12 = scmp.lt.u32.totalorder %s2271_s7, %s2513_s30 }
  0x1e   : > { %p2275_p7 = pneg %p2274_p6  ;;  %p2279_p13 = por %p2278_p10, %p2277_p4 }
  0x20   : > { %p2281_p1 = por %p2280_p12, %p2279_p13 }
  0x22   : > { %p2282_p2 = pnand %p2281_p1, %p2275_p7 }
  0x24   : > { %2285 = shalt.err (!%p2282_p2)
}
  0x25   : > { %s2286_s20 = scalar_lea.vmem %s2515_s4, 32  ;;  %s2419_s26 = smov [#allocation2]  }
  0x26   : > { %p2287_p3 = scmp.ne.s32.totalorder %s2515_s4, %s2286_s20  ;;  %s2291_s27 = sshll.u32 %s2419_s26, 4  ;;  %s2292_s27 = int_to_ptr.vmem [resolvable:$false] %s2291_s27 }
  0x27   : > { %s2293_s28 = scalar_lea.vmem %s2292_s27, 64  ;;  %p2294_p9 = scmp.lt.s32.totalorder %s2515_s4, %s2292_s27 }
  0x28   : > { %p2289_p6 = pnand %p2287_p3, %p2273_p5  ;;  %p2295_p4 = scmp.lt.s32.totalorder %s2293_s28, %s2286_s20 }
  0x2a   : > { %p2290_p11 = pneg %p2289_p6  ;;  %p2296_p10 = por %p2295_p4, %p2294_p9 }
  0x2c   : > { %p2297_p12 = pnand %p2296_p10, %p2290_p11 }
  0x2e   : > { %2300 = shalt.err (!%p2297_p12)
}
  0x2f   : > { %2207 = dma.hbm_to_vmem [thread:$0]  (!%p2519_p0), %s2513_s30, 32, %s2515_s4, %s134_s6  }
  0x30   : > { %p3650_p1 = scmp.lt.s32.totalorder %s2417_s14, 3  ;;  %p3651_p2 = scmp.ge.s32.totalorder %s2417_s14, 1 }
  0x31   : > { %s1789_s3 = sshll.u32 %s2506_s25, 9  ;;  %s1802_s7 = sshll.u32 %s2413_s13, 13 }
  0x32   : > { %p2555_p7 = pnand %p3651_p2, %p3650_p1  ;;  %s2564_s16 = scalar_lea.hbm %s3498_s1, %s1802_s7 }
  0x33   : > { %s158_s18 = scalar_lea.vmem [#allocation5], %s1789_s3  ;;  %s155_s30 = scalar_lea.sflag [#allocation6], %s2506_s25 }
  0x34   : > { %s168_s19 = sshll.u32 %s158_s18, 4  ;;  %s2301_s4 = scalar_lea.hbm %s2564_s16, 8192  ;;  %s2566_s19 = int_to_ptr.vmem [resolvable:$true] %s168_s19 }
  0x35   : > { %p2302_p9 = scmp.ne.s32.totalorder %s2564_s16, %s2301_s4  ;;  %s2306_s26 = scalar_lea.hbm %s3498_s1, 16384 }
  0x36   : > { %p2307_p3 = scmp.lt.u32.totalorder %s2564_s16, %s3498_s1  ;;  %p2308_p6 = scmp.lt.u32.totalorder %s2306_s26, %s2301_s4 }
  0x37   : > { %p2304_p11 = pnand %p2302_p9, %p2273_p5  ;;  %p2310_p10 = scmp.lt.u32.totalorder %s2301_s4, %s2564_s16 }
  0x38   : > { %p2309_p4 = por %p2308_p6, %p2307_p3 }
  0x39   : > { %p2305_p13 = pneg %p2304_p11 }
  0x3a   : > { %p2311_p12 = por %p2310_p10, %p2309_p4 }
  0x3c   : > { %p2312_p1 = pnand %p2311_p12, %p2305_p13 }
  0x3e   : > { %2315 = shalt.err (!%p2312_p1)
}
  0x3f   : > { %s2316_s3 = scalar_lea.vmem %s2566_s19, 8192  ;;  %s2420_s7 = smov [#allocation5]  }
  0x40   : > { %p2317_p2 = scmp.ne.s32.totalorder %s2566_s19, %s2316_s3  ;;  %s2321_s8 = sshll.u32 %s2420_s7, 4  ;;  %s2322_s8 = int_to_ptr.vmem [resolvable:$false] %s2321_s8 }
  0x41   : > { %s2323_s15 = scalar_lea.vmem %s2322_s8, 16384  ;;  %p2324_p8 = scmp.lt.s32.totalorder %s2566_s19, %s2322_s8 }
  0x42   : > { %p2319_p9 = pnand %p2317_p2, %p2273_p5  ;;  %p2325_p3 = scmp.lt.s32.totalorder %s2323_s15, %s2316_s3 }
  0x44   : > { %p2320_p11 = pneg %p2319_p9  ;;  %p2326_p6 = por %p2325_p3, %p2324_p8 }
  0x46   : > { %p2327_p4 = pnand %p2326_p6, %p2320_p11 }
  0x48   : > { %2330 = shalt.err (!%p2327_p4)
}
  0x49   : > { %s2421_s18 = smov 256   ;;  %s2422_s4 = smov 16  }
  0x4a   : > { %2210 = dma.hbm_to_vmem [thread:$0]  (!%p2519_p0), %s2564_s16, 8192, %s2566_s19, %s155_s30, %s2421_s18, %s2421_s18, %s2422_s4  }
  0x4b   : > { %180 = sbr.rel (%p2555_p7) target bundleno = 700 (0x2bc), region = 28 }
  0x52   : > { %s2597_s6 = sand.u32 1, %s2401_s10   ;;  %p3653_p8 = scmp.ne.s32.totalorder %s3646_s21, 0 }
  0x53   : > { %s1793_s20 = sshll.u32 %s2597_s6, 1  ;;  %s183_s26 = scalar_lea.sflag [#allocation3], %s2597_s6 }
  0x54   : > { %s2603_s27 = scalar_lea.vmem [#allocation2], %s1793_s20 }
  0x55   : > { %2384 = dma.done.wait (%p3653_p8), %s183_s26, 32  }
  0x56   : > { %2386 = vsyncadd (%p3653_p8), %s183_s26, 4294967264  ;;  %s1794_s25 = sshll.u32 %s2597_s6, 9  ;;  %s192_s5 = scalar_lea.sflag [#allocation6], %s2597_s6 }
  0x57   : > { %s2611_s29 = scalar_lea.vmem [#allocation5], %s1794_s25 }
  0x58   : > { %2388 = dma.done.wait (%p3653_p8), %s192_s5, 8192  }
  0x59   : > { %2390 = vsyncadd (%p3653_p8), %s192_s5, 4294959104  ;;  %v234_v0 = vld [vmem:[%s2611_s29 + $0x8] sm:$0xff]  ;;  %v236_v1 = vld [vmem:[%s2611_s29 + $0x18] sm:$0xff]  ;;  %v3502_v60 = vlaneseq  ;;  %s3424_s21 = scalar_lea.vmem [#allocation7], %s1793_s20  ;;  %vm1632_vm1 = vcmask 1040384   ;;  %s1803_s16 = sshll.u32 %s2409_s12, 5 }
  0x5a   : > { %v233_v2 = vld [vmem:[%s2611_s29] sm:$0xff]  ;;  %v309_v3 = vand.u32 4294901760, %v234_v0  ;;  %v313_v4 = vand.u32 4294901760, %v236_v1  ;;  %v235_v5 = vld [vmem:[%s2611_s29 + $0x10] sm:$0xff]  ;;  %v238_v7 = vld [vmem:[%s2611_s29 + $0x28] sm:$0xff]  ;;  %s1675_s19 = sshll.u32 %s3424_s21, 4  ;;  %s3445_s3 = scalar_lea.hbm %s3499_s2, %s1803_s16  ;;  %s3447_s19 = int_to_ptr.vmem [resolvable:$true] %s1675_s19 }
  0x5b   : > { %v311_v6 = vand.u32 4294901760, %v233_v2  ;;  %v240_v8 = vld [vmem:[%s2611_s29 + $0x38] sm:$0xff]  ;;  %v315_v9 = vand.u32 4294901760, %v235_v5  ;;  %v317_v10 = vand.u32 4294901760, %v238_v7  ;;  %v237_v12 = vld [vmem:[%s2611_s29 + $0x20] sm:$0xff]  ;;  %v239_v13 = vld [vmem:[%s2611_s29 + $0x30] sm:$0xff] }
  0x5c   : > { %v321_v11 = vand.u32 4294901760, %v240_v8  ;;  %v242_v14 = vld [vmem:[%s2611_s29 + $0x48] sm:$0xff]  ;;  %v2626_v15 = vpack.c.bf16 %v313_v4, %v309_v3  ;;  %v244_v16 = vld [vmem:[%s2611_s29 + $0x58] sm:$0xff]  ;;  %v2630_v17 = vld [vmem:[%s2611_s29 + $0x40] sm:$0xff]  ;;  %v319_v23 = vand.u32 4294901760, %v237_v12  ;;  %v323_v24 = vand.u32 4294901760, %v239_v13 }
  0x5d   : > { %v2633_v18 = vld [vmem:[%s2611_s29 + $0x50] sm:$0xff]  ;;  %v2635_v19 = vpack.c.bf16 %v315_v9, %v311_v6  ;;  %v2640_v21 = vld [vmem:[%s2611_s29 + $0x68] sm:$0xff]  ;;  %v2643_v22 = vld [vmem:[%s2611_s29 + $0x78] sm:$0xff]  ;;  %v325_v25 = vand.u32 4294901760, %v242_v14  ;;  %v329_v26 = vand.u32 4294901760, %v244_v16  ;;  %v327_v27 = vand.u32 4294901760, %v2630_v17 }
  0x5e   : > { %3654 = vst [vmem:[#allocation11_spill] sm:$0xff] %v2626_v15  ;;  %v2637_v20 = vpack.c.bf16 %v321_v11, %v317_v10  ;;  %1805 = vmatprep.subr.bf16.mxu1 %v2626_v15  ;;  %1997 = vmatprep.subr.bf16.mxu0 %v2626_v15  ;;  %v331_v28 = vand.u32 4294901760, %v2633_v18  ;;  %v2653_v29 = vpack.c.bf16 %v323_v24, %v319_v23  ;;  %v333_v30 = vand.u32 4294901760, %v2640_v21  ;;  %v245_v32 = vld [vmem:[%s2611_s29 + $0x60] sm:$0xff]  ;;  %v247_v33 = vld [vmem:[%s2611_s29 + $0x70] sm:$0xff]  ;;  %v250_v35 = vld [vmem:[%s2611_s29 + $0x88] sm:$0xff] }
  0x5f   : > { %3655 = vst [vmem:[#allocation12_spill] sm:$0xff] %v2635_v19  ;;  %1807 = vmatpush1.bf16.msra.mxu1 %v2635_v19  ;;  %1999 = vmatpush1.bf16.msra.mxu0 %v2635_v19  ;;  %v337_v31 = vand.u32 4294901760, %v2643_v22  ;;  %v2659_v34 = vpack.c.bf16 %v329_v26, %v325_v25  ;;  %v252_v36 = vld [vmem:[%s2611_s29 + $0x98] sm:$0xff]  ;;  %v335_v38 = vand.u32 4294901760, %v245_v32  ;;  %v339_v39 = vand.u32 4294901760, %v247_v33  ;;  %v249_v40 = vld [vmem:[%s2611_s29 + $0x80] sm:$0xff] }
  0x60   : > { %3656 = vst [vmem:[#allocation13_spill] sm:$0xff] %v2637_v20  ;;  %1809 = vmatprep.subr.bf16.mxu1 %v2637_v20  ;;  %2001 = vmatprep.subr.bf16.mxu0 %v2637_v20  ;;  %3657 = vst [vmem:[#allocation14_spill] sm:$0xff] %v2653_v29  ;;  %v2665_v37 = vpack.c.bf16 %v331_v28, %v327_v27  ;;  %v251_v41 = vld [vmem:[%s2611_s29 + $0x90] sm:$0xff]  ;;  %v2669_v42 = vsub.f32 %v234_v0, %v309_v3  ;;  %v341_v44 = vand.u32 4294901760, %v250_v35  ;;  %v254_v50 = vld [vmem:[%s2611_s29 + $0xa8] sm:$0xff]  ;;  %s1661_s7 = scalar_lea.sflag [#allocation4], %s2597_s6 }
  0x61   : > { %3658 = vst [vmem:[#allocation15_spill] sm:$0xff] %v2659_v34  ;;  %v2673_v43 = vpack.c.bf16 %v337_v31, %v333_v30  ;;  %v345_v45 = vand.u32 4294901760, %v252_v36  ;;  %v2675_v46 = vsub.f32 %v236_v1, %v313_v4  ;;  %v2677_v47 = vsub.f32 %v233_v2, %v311_v6  ;;  %v256_v51 = vld [vmem:[%s2611_s29 + $0xb8] sm:$0xff]  ;;  %v253_v59 = vld [vmem:[%s2611_s29 + $0xa0] sm:$0xff]  ;;  %v255_v1 = vld [vmem:[%s2611_s29 + $0xb0] sm:$0xff]  ;;  %s2331_s12 = scalar_lea.vmem %s3447_s19, 32 }
  0x62   : > { %3659 = vst [vmem:[#allocation16_spill] sm:$0xff] %v2665_v37  ;;  %3660 = vst [vmem:[#allocation17_spill] sm:$0xff] %v2669_v42  ;;  %v2679_v48 = vsub.f32 %v235_v5, %v315_v9  ;;  %v2681_v49 = vsub.f32 %v238_v7, %v317_v10  ;;  %v2685_v52 = vsub.f32 %v240_v8, %v321_v11  ;;  %v343_v54 = vand.u32 4294901760, %v249_v40  ;;  %v258_v2 = vld [vmem:[%s2611_s29 + $0xc8] sm:$0xff]  ;;  %v260_v3 = vld [vmem:[%s2611_s29 + $0xd8] sm:$0xff]  ;;  %p2332_p0 = scmp.ne.s32.totalorder %s3447_s19, %s2331_s12  ;;  %p3922_p5 = scmp.ne.s32.totalorder %s3647_s22, 0 }
  0x63   : > { %1811 = vmatpush1.bf16.msra.mxu1 %v2653_v29  ;;  %2003 = vmatpush1.bf16.msra.mxu0 %v2653_v29  ;;  %3661 = vst [vmem:[#allocation18_spill] sm:$0xff] %v2673_v43  ;;  %3662 = vst [vmem:[#allocation19_spill] sm:$0xff] %v2675_v46  ;;  %v2687_v53 = vsub.f32 %v237_v12, %v319_v23  ;;  %v347_v55 = vand.u32 4294901760, %v251_v41  ;;  %v2689_v56 = vsub.f32 %v239_v13, %v323_v24  ;;  %v257_v12 = vld [vmem:[%s2611_s29 + $0xc0] sm:$0xff]  ;;  %v259_v13 = vld [vmem:[%s2611_s29 + $0xd0] sm:$0xff]  ;;  %s2425_s8 = smov [#allocation7]  }
  0x64   : > { %1813 = vmatprep.subr.bf16.mxu1 %v2659_v34  ;;  %2005 = vmatprep.subr.bf16.mxu0 %v2659_v34  ;;  %3663 = vst [vmem:[#allocation20_spill] sm:$0xff] %v2677_v47  ;;  %3664 = vst [vmem:[#allocation21_spill] sm:$0xff] %v2679_v48  ;;  %v2691_v57 = vsub.f32 %v242_v14, %v325_v25  ;;  %v2695_v58 = vpack.c.bf16 %v339_v39, %v335_v38  ;;  %v349_v63 = vand.u32 4294901760, %v254_v50  ;;  %v273_v20 = vld [vmem:[%s2611_s29 + $0x140] sm:$0xff]  ;;  %v275_v19 = vld [vmem:[%s2611_s29 + $0x150] sm:$0xff]  ;;  %p2333_p7 = pnand %p2332_p0, %p3922_p5  ;;  %s2335_s15 = sshll.u32 %s2425_s8, 4  ;;  %s2336_s15 = int_to_ptr.vmem [resolvable:$false] %s2335_s15 }
  0x65   : > { %3665 = vst [vmem:[#allocation22_spill] sm:$0xff] %v2685_v52  ;;  %3666 = vst [vmem:[#allocation23_spill] sm:$0xff] %v2687_v53  ;;  %v2698_v61 = vsub.f32 %v244_v16, %v329_v26  ;;  %v2702_v62 = vpack.c.bf16 %v345_v45, %v341_v44  ;;  %v353_v0 = vand.u32 4294901760, %v256_v51  ;;  %v2708_v4 = vsub.f32 %v2630_v17, %v327_v27  ;;  %s2337_s18 = scalar_lea.vmem %s2336_s15, 64  ;;  %p2338_p10 = scmp.lt.s32.totalorder %s3447_s19, %s2336_s15 }
  0x66   : > { %3667 = vst [vmem:[#allocation24_spill] sm:$0xff] %v2689_v56  ;;  %3668 = vst [vmem:[#allocation25_spill] sm:$0xff] %v2695_v58  ;;  %v2711_v5 = vsub.f32 %v2633_v18, %v331_v28  ;;  %v2714_v6 = vsub.f32 %v2640_v21, %v333_v30  ;;  %v2717_v7 = vsub.f32 %v2643_v22, %v337_v31  ;;  %v351_v14 = vand.u32 4294901760, %v253_v59  ;;  %v262_v21 = vld [vmem:[%s2611_s29 + $0xe8] sm:$0xff]  ;;  %v264_v22 = vld [vmem:[%s2611_s29 + $0xf8] sm:$0xff]  ;;  %p2334_p13 = pneg %p2333_p7  ;;  %p2339_p12 = scmp.lt.s32.totalorder %s2337_s18, %s2331_s12 }
  0x67   : > { %1815 = vmatpush1.bf16.msra.mxu1 %v2665_v37  ;;  %2007 = vmatpush1.bf16.msra.mxu0 %v2665_v37  ;;  %3669 = vst [vmem:[#allocation26_spill] sm:$0xff] %v2702_v62  ;;  %v2719_v8 = vsub.f32 %v245_v32, %v335_v38  ;;  %v2721_v9 = vsub.f32 %v247_v33, %v339_v39  ;;  %v355_v16 = vand.u32 4294901760, %v255_v1  ;;  %v357_v17 = vand.u32 4294901760, %v258_v2  ;;  %v261_v31 = vld [vmem:[%s2611_s29 + $0xe0] sm:$0xff]  ;;  %v263_v32 = vld [vmem:[%s2611_s29 + $0xf0] sm:$0xff]  ;;  %v266_v39 = vld [vmem:[%s2611_s29 + $0x108] sm:$0xff] }
  0x68   : > { %1817 = vmatprep.subr.bf16.mxu1 %v2673_v43  ;;  %2009 = vmatprep.subr.bf16.mxu0 %v2673_v43  ;;  %3670 = vst [vmem:[#allocation27_spill] sm:$0xff] %v2714_v6  ;;  %3671 = vst [vmem:[#allocation28_spill] sm:$0xff] %v2717_v7  ;;  %v2723_v10 = vsub.f32 %v250_v35, %v341_v44  ;;  %v2725_v11 = vpack.c.bf16 %v347_v55, %v343_v54  ;;  %v361_v18 = vand.u32 4294901760, %v260_v3  ;;  %p2340_p1 = por %p2339_p12, %p2338_p10 }
  0x69   : > { %3672 = vst [vmem:[#allocation29_spill] sm:$0xff] %v2719_v8  ;;  %3673 = vst [vmem:[#allocation30_spill] sm:$0xff] %v2721_v9  ;;  %v2734_v23 = vsub.f32 %v252_v36, %v345_v45  ;;  %v2737_v24 = vsub.f32 %v249_v40, %v343_v54  ;;  %v2739_v25 = vpack.c.bf16 %v353_v0, %v349_v63  ;;  %v359_v28 = vand.u32 4294901760, %v257_v12  ;;  %v268_v40 = vld [vmem:[%s2611_s29 + $0x118] sm:$0xff] }
  0x6a   : > { %3674 = vst [vmem:[#allocation31_spill] sm:$0xff] %v2723_v10  ;;  %3675 = vst [vmem:[#allocation32_spill] sm:$0xff] %v2725_v11  ;;  %v2741_v26 = vsub.f32 %v251_v41, %v347_v55  ;;  %v2743_v27 = vsub.f32 %v254_v50, %v349_v63  ;;  %v363_v30 = vand.u32 4294901760, %v259_v13  ;;  %v2747_v33 = vsub.f32 %v256_v51, %v353_v0  ;;  %v265_v50 = vld [vmem:[%s2611_s29 + $0x100] sm:$0xff]  ;;  %v267_v0 = vld [vmem:[%s2611_s29 + $0x110] sm:$0xff]  ;;  %p2341_p2 = pnand %p2340_p1, %p2334_p13 }
  0x6b   : > { %1819 = vmatpush1.bf16.msra.mxu1 %v2695_v58  ;;  %2011 = vmatpush1.bf16.msra.mxu0 %v2695_v58  ;;  %3676 = vst [vmem:[#allocation33_spill] sm:$0xff] %v2734_v23  ;;  %3677 = vst [vmem:[#allocation34_spill] sm:$0xff] %v2737_v24  ;;  %v2749_v35 = vsub.f32 %v253_v59, %v351_v14  ;;  %v365_v36 = vand.u32 4294901760, %v262_v21  ;;  %v369_v38 = vand.u32 4294901760, %v264_v22  ;;  %v2763_v51 = vshrl.u32 %v3502_v60, 7  ;;  %v271_v58 = vld [vmem:[%s2611_s29 + $0x130] sm:$0xff] }
  0x6c   : > { %1821 = vmatprep.subr.bf16.mxu1 %v2702_v62  ;;  %2013 = vmatprep.subr.bf16.mxu0 %v2702_v62  ;;  %3678 = vst [vmem:[#allocation35_spill] sm:$0xff] %v2739_v25  ;;  %3679 = vst [vmem:[#allocation36_spill] sm:$0xff] %v2741_v26  ;;  %v2755_v41 = vpack.c.bf16 %v355_v16, %v351_v14  ;;  %v2757_v44 = vsub.f32 %v255_v1, %v355_v16  ;;  %v367_v59 = vand.u32 4294901760, %v261_v31  ;;  %v270_v1 = vld [vmem:[%s2611_s29 + $0x128] sm:$0xff]  ;;  %v272_v14 = vld [vmem:[%s2611_s29 + $0x138] sm:$0xff] }
  0x6d   : > { %3680 = vst [vmem:[#allocation37_spill] sm:$0xff] %v2743_v27  ;;  %v2759_v45 = vpack.c.bf16 %v361_v18, %v357_v17  ;;  %3683 = vst [vmem:[#allocation40_spill] sm:$0xff] %v2763_v51  ;;  %v2767_v54 = vsub.f32 %v258_v2, %v357_v17  ;;  %v2769_v55 = vsub.f32 %v260_v3, %v361_v18  ;;  %v371_v63 = vand.u32 4294901760, %v263_v32  ;;  %v269_v18 = vld [vmem:[%s2611_s29 + $0x120] sm:$0xff] }
  0x6e   : > { %3681 = vst [vmem:[#allocation38_spill] sm:$0xff] %v2755_v41  ;;  %v2774_v16 = vpack.c.bf16 %v363_v30, %v359_v28  ;;  %v2776_v60 = vsub.f32 %v257_v12, %v359_v28  ;;  %v377_v62 = vand.u32 4294901760, %v268_v40  ;;  %v2780_v2 = vpack.c.bf16 %v369_v38, %v365_v36 }
  0x6f   : > { %1823 = vmatpush1.bf16.msra.mxu1 %v2725_v11  ;;  %2015 = vmatpush1.bf16.msra.mxu0 %v2725_v11  ;;  %3682 = vst [vmem:[#allocation39_spill] sm:$0xff] %v2759_v45  ;;  %3684 = vst [vmem:[#allocation41_spill] sm:$0xff] %v2767_v54  ;;  %v373_v11 = vand.u32 4294901760, %v266_v39  ;;  %v2782_v17 = vsub.f32 %v262_v21, %v365_v36  ;;  %v375_v3 = vand.u32 4294901760, %v265_v50  ;;  %v379_v12 = vand.u32 4294901760, %v267_v0 }
  0x70   : > { %1825 = vmatprep.subr.bf16.mxu1 %v2739_v25  ;;  %2017 = vmatprep.subr.bf16.mxu0 %v2739_v25  ;;  %3685 = vst [vmem:[#allocation42_spill] sm:$0xff] %v2769_v55  ;;  %3686 = vst [vmem:[#allocation43_spill] sm:$0xff] %v2774_v16  ;;  %v2778_v25 = vsub.f32 %v259_v13, %v363_v30  ;;  %v2788_v43 = vsub.f32 %v264_v22, %v369_v38  ;;  %v381_v28 = vand.u32 4294901760, %v270_v1  ;;  %v274_v13 = vld [vmem:[%s2611_s29 + $0x148] sm:$0xff]  ;;  %v276_v30 = vld [vmem:[%s2611_s29 + $0x158] sm:$0xff] }
  0x71   : > { %3687 = vst [vmem:[#allocation44_spill] sm:$0xff] %v2776_v60  ;;  %3689 = vst [vmem:[#allocation46_spill] sm:$0xff] %v2780_v2  ;;  %v385_v37 = vand.u32 4294901760, %v272_v14  ;;  %v2794_v21 = vpack.c.bf16 %v371_v63, %v367_v59  ;;  %v2796_v36 = vsub.f32 %v261_v31, %v367_v59  ;;  %v2800_v22 = vpack.c.bf16 %v377_v62, %v373_v11  ;;  %v278_v31 = vld [vmem:[%s2611_s29 + $0x168] sm:$0xff] }
  0x72   : > { %3688 = vst [vmem:[#allocation45_spill] sm:$0xff] %v2778_v25  ;;  %3690 = vst [vmem:[#allocation47_spill] sm:$0xff] %v2782_v17  ;;  %v2802_v38 = vsub.f32 %v266_v39, %v373_v11  ;;  %v383_v34 = vand.u32 4294901760, %v269_v18  ;;  %v387_v29 = vand.u32 4294901760, %v271_v58  ;;  %v2806_v15 = vsub.f32 %v268_v40, %v377_v62  ;;  %v277_v62 = vld [vmem:[%s2611_s29 + $0x160] sm:$0xff]  ;;  %v287_v25 = vld [vmem:[%s2611_s29 + $0x1b0] sm:$0xff] }
  0x73   : > { %1827 = vmatpush1.bf16.msra.mxu1 %v2755_v41  ;;  %2019 = vmatpush1.bf16.msra.mxu0 %v2755_v41  ;;  %3691 = vst [vmem:[#allocation48_spill] sm:$0xff] %v2788_v43  ;;  %3692 = vst [vmem:[#allocation49_spill] sm:$0xff] %v2794_v21  ;;  %v2798_v41 = vsub.f32 %v263_v32, %v371_v63  ;;  %v2808_v43 = vsub.f32 %v265_v50, %v375_v3  ;;  %v393_v17 = vand.u32 4294901760, %v276_v30  ;;  %v280_v32 = vld [vmem:[%s2611_s29 + $0x178] sm:$0xff] }
  0x74   : > { %1829 = vmatprep.subr.bf16.mxu1 %v2759_v45  ;;  %2021 = vmatprep.subr.bf16.mxu0 %v2759_v45  ;;  %3693 = vst [vmem:[#allocation50_spill] sm:$0xff] %v2796_v36  ;;  %3695 = vst [vmem:[#allocation52_spill] sm:$0xff] %v2800_v22  ;;  %v389_v45 = vand.u32 4294901760, %v274_v13  ;;  %v2814_v11 = vpack.c.bf16 %v379_v12, %v375_v3  ;;  %v2816_v39 = vsub.f32 %v267_v0, %v379_v12  ;;  %v279_v0 = vld [vmem:[%s2611_s29 + $0x170] sm:$0xff]  ;;  %v282_v12 = vld [vmem:[%s2611_s29 + $0x188] sm:$0xff] }
  0x75   : > { %3694 = vst [vmem:[#allocation51_spill] sm:$0xff] %v2798_v41  ;;  %3696 = vst [vmem:[#allocation53_spill] sm:$0xff] %v2802_v38  ;;  %v2818_v59 = vpack.c.bf16 %v385_v37, %v381_v28  ;;  %v2822_v40 = vsub.s32 0, %v2763_v51  ;;  %v2826_v50 = vsub.f32 %v270_v1, %v381_v28  ;;  %v2828_v63 = vsub.f32 %v272_v14, %v385_v37  ;;  %v281_v14 = vld [vmem:[%s2611_s29 + $0x180] sm:$0xff] }
  0x76   : > { %3697 = vst [vmem:[#allocation54_spill] sm:$0xff] %v2806_v15  ;;  %3698 = vst [vmem:[#allocation55_spill] sm:$0xff] %v2808_v43  ;;  %v391_v3 = vand.u32 4294901760, %v273_v20  ;;  %v2833_v43 = vpack.c.bf16 %v387_v29, %v383_v34  ;;  %v2835_v15 = vsub.f32 %v269_v18, %v383_v34  ;;  %v397_v38 = vand.u32 4294901760, %v278_v31  ;;  %v285_v36 = vld [vmem:[%s2611_s29 + $0x1a0] sm:$0xff] }
  0x77   : > { %1831 = vmatpush1.bf16.msra.mxu1 %v2774_v16  ;;  %2023 = vmatpush1.bf16.msra.mxu0 %v2774_v16  ;;  %3699 = vst [vmem:[#allocation56_spill] sm:$0xff] %v2814_v11  ;;  %3700 = vst [vmem:[#allocation57_spill] sm:$0xff] %v2816_v39  ;;  %v395_v16 = vand.u32 4294901760, %v275_v19  ;;  %v284_v39 = vld [vmem:[%s2611_s29 + $0x198] sm:$0xff]  ;;  %v401_v41 = vand.u32 4294901760, %v280_v32  ;;  %v2839_v1 = vpack.c.bf16 %v393_v17, %v389_v45  ;;  %v403_v34 = vand.u32 4294901760, %v279_v0 }
  0x78   : > { %3701 = vst [vmem:[#allocation58_spill] sm:$0xff] %v2818_v59  ;;  %3702 = vst [vmem:[#allocation59_spill] sm:$0xff] %v2822_v40  ;;  %1833 = vmatprep.subr.bf16.mxu1 %v2780_v2  ;;  %2025 = vmatprep.subr.bf16.mxu0 %v2780_v2  ;;  %v2837_v2 = vsub.f32 %v271_v58, %v387_v29  ;;  %v2841_v28 = vsub.f32 %v274_v13, %v389_v45  ;;  %v405_v18 = vand.u32 4294901760, %v282_v12  ;;  %v286_v29 = vld [vmem:[%s2611_s29 + $0x1a8] sm:$0xff]  ;;  %v288_v58 = vld [vmem:[%s2611_s29 + $0x1b8] sm:$0xff] }
  0x79   : > { %3703 = vst [vmem:[#allocation60_spill] sm:$0xff] %v2826_v50  ;;  %3704 = vst [vmem:[#allocation61_spill] sm:$0xff] %v2828_v63  ;;  %v2843_v37 = vsub.f32 %v276_v30, %v393_v17  ;;  %v283_v63 = vld [vmem:[%s2611_s29 + $0x190] sm:$0xff]  ;;  %v399_v50 = vand.u32 4294901760, %v277_v62  ;;  %v2853_v45 = vpack.c.bf16 %v395_v16, %v391_v3  ;;  %v2855_v17 = vsub.f32 %v273_v20, %v391_v3 }
  0x7a   : > { %3705 = vst [vmem:[#allocation62_spill] sm:$0xff] %v2833_v43  ;;  %3706 = vst [vmem:[#allocation63_spill] sm:$0xff] %v2835_v15  ;;  %v409_v15 = vand.u32 4294901760, %v284_v39  ;;  %v2857_v13 = vsub.f32 %v275_v19, %v395_v16  ;;  %v2866_v60 = vsub.f32 %v280_v32, %v401_v41  ;;  %v413_v20 = vand.u32 4294901760, %v286_v29  ;;  %v232_v16 = vld [vmem:[%s2603_s27] sm:$0x3] }
  0x7b   : > { %3707 = vst [vmem:[#allocation64_spill] sm:$0xff] %v2837_v2  ;;  %3708 = vst [vmem:[#allocation65_spill] sm:$0xff] %v2839_v1  ;;  %1835 = vmatpush1.bf16.msra.mxu1 %v2794_v21  ;;  %2027 = vmatpush1.bf16.msra.mxu0 %v2794_v21  ;;  %v2860_v21 = vpack.c.bf16 %v401_v41, %v397_v38  ;;  %v411_v2 = vand.u32 4294901760, %v283_v63  ;;  %v417_v19 = vand.u32 4294901760, %v288_v58  ;;  %v290_v41 = vld [vmem:[%s2611_s29 + $0x1c8] sm:$0xff]  ;;  %v415_v30 = vand.u32 4294901760, %v285_v36 }
  0x7c   : > { %3709 = vst [vmem:[#allocation66_spill] sm:$0xff] %v2841_v28  ;;  %3710 = vst [vmem:[#allocation67_spill] sm:$0xff] %v2843_v37  ;;  %1837 = vmatprep.subr.bf16.mxu1 %v2800_v22  ;;  %2029 = vmatprep.subr.bf16.mxu0 %v2800_v22  ;;  %v2862_v37 = vsub.f32 %v278_v31, %v397_v38  ;;  %v407_v28 = vand.u32 4294901760, %v281_v14  ;;  %v2868_v22 = vsub.f32 %v277_v62, %v399_v50 }
  0x7d   : > { %3711 = vst [vmem:[#allocation68_spill] sm:$0xff] %v2853_v45  ;;  %3712 = vst [vmem:[#allocation69_spill] sm:$0xff] %v2855_v17  ;;  %v2873_v38 = vpack.c.bf16 %v403_v34, %v399_v50  ;;  %v2875_v31 = vsub.f32 %v279_v0, %v403_v34  ;;  %v2877_v3 = vpack.c.bf16 %v409_v15, %v405_v18  ;;  %v291_v50 = vld [vmem:[%s2611_s29 + $0x1d0] sm:$0xff] }
  0x7e   : > { %3713 = vst [vmem:[#allocation70_spill] sm:$0xff] %v2857_v13  ;;  %3714 = vst [vmem:[#allocation71_spill] sm:$0xff] %v2860_v21  ;;  %v2882_v32 = vsub.f32 %v282_v12, %v405_v18  ;;  %v2884_v62 = vsub.f32 %v284_v39, %v409_v15  ;;  %v2891_v0 = vsub.f32 %v281_v14, %v407_v28  ;;  %v421_v12 = vand.u32 4294901760, %v290_v41  ;;  %v294_v15 = vld [vmem:[%s2611_s29 + $0x1e8] sm:$0xff] }
  0x7f   : > { %3715 = vst [vmem:[#allocation72_spill] sm:$0xff] %v2862_v37  ;;  %3716 = vst [vmem:[#allocation73_spill] sm:$0xff] %v2866_v60  ;;  %1839 = vmatpush1.bf16.msra.mxu1 %v2814_v11  ;;  %2031 = vmatpush1.bf16.msra.mxu0 %v2814_v11  ;;  %v292_v60 = vld [vmem:[%s2611_s29 + $0x1d8] sm:$0xff]  ;;  %v289_v11 = vld [vmem:[%s2611_s29 + $0x1c0] sm:$0xff]  ;;  %v2889_v37 = vpack.c.bf16 %v411_v2, %v407_v28  ;;  %v2893_v34 = vsub.f32 %v283_v63, %v411_v2  ;;  %v3728_v39 = vsub.s32 1, %v2763_v51 }
  0x80   : > { %3717 = vst [vmem:[#allocation74_spill] sm:$0xff] %v2868_v22  ;;  %3718 = vst [vmem:[#allocation75_spill] sm:$0xff] %v2873_v38  ;;  %1841 = vmatprep.subr.bf16.mxu1 %v2818_v59  ;;  %2033 = vmatprep.subr.bf16.mxu0 %v2818_v59  ;;  %v419_v22 = vand.u32 4294901760, %v287_v25  ;;  %v2896_v13 = vpack.c.bf16 %v417_v19, %v413_v20  ;;  %v2898_v59 = vsub.f32 %v286_v29, %v413_v20 }
  0x81   : > { %3719 = vst [vmem:[#allocation76_spill] sm:$0xff] %v2875_v31  ;;  %3720 = vst [vmem:[#allocation77_spill] sm:$0xff] %v2877_v3  ;;  %v302_v31 = vrot.slane %v232_v16, %v2822_v40  ;;  %v306_v18 = vrot.slane %v232_v16, %v3728_v39  ;;  %v425_v28 = vand.u32 4294901760, %v292_v60  ;;  %v423_v14 = vand.u32 4294901760, %v289_v11 }
  0x82   : > { %3721 = vst [vmem:[#allocation78_spill] sm:$0xff] %v2882_v32  ;;  %3722 = vst [vmem:[#allocation79_spill] sm:$0xff] %v2884_v62  ;;  %v427_v2 = vand.u32 4294901760, %v291_v50  ;;  %v2909_v29 = vsub.f32 %v288_v58, %v417_v19  ;;  %v2911_v20 = vpack.c.bf16 %v419_v22, %v415_v30  ;;  %v2913_v40 = vsub.f32 %v285_v36, %v415_v30 }
  0x83   : > { %3723 = vst [vmem:[#allocation80_spill] sm:$0xff] %v2889_v37  ;;  %3724 = vst [vmem:[#allocation81_spill] sm:$0xff] %v2891_v0  ;;  %1843 = vmatpush1.bf16.msra.mxu1 %v2833_v43  ;;  %2035 = vmatpush1.bf16.msra.mxu0 %v2833_v43  ;;  %v2905_v63 = vand.u32 4294901760, %v302_v31  ;;  %v2915_v16 = vand.u32 4294901760, %v306_v18  ;;  %v2917_v39 = vsub.f32 %v287_v25, %v419_v22  ;;  %v296_v43 = vld [vmem:[%s2611_s29 + $0x1f8] sm:$0xff]  ;;  %v468_v58 = vand.u32 4294901760, %v2675_v46 }
  0x84   : > { %3725 = vst [vmem:[#allocation82_spill] sm:$0xff] %v2893_v34  ;;  %3726 = vst [vmem:[#allocation83_spill] sm:$0xff] %v2896_v13  ;;  %1845 = vmatprep.subr.bf16.mxu1 %v2839_v1  ;;  %2037 = vmatprep.subr.bf16.mxu0 %v2839_v1  ;;  %v2919_v51 = vsub.f32 %v290_v41, %v421_v12  ;;  %v456_v34 = vand.u32 4294901760, %v2669_v42  ;;  %v462_v36 = vand.u32 4294901760, %v2677_v47  ;;  %v474_v41 = vand.u32 4294901760, %v2679_v48 }
  0x85   : > { %3727 = vst [vmem:[#allocation84_spill] sm:$0xff] %v2898_v59  ;;  %3729 = vst [vmem:[#allocation85_spill] sm:$0xff] %v2905_v63  ;;  %v429_v59 = vand.u32 4294901760, %v294_v15  ;;  %v2924_v0 = vsub.f32 %v306_v18, %v2915_v16  ;;  %v2928_v19 = vsub.f32 %v302_v31, %v2905_v63  ;;  %v2933_v25 = vpack.c.bf16 %v425_v28, %v421_v12  ;;  %v293_v18 = vld [vmem:[%s2611_s29 + $0x1e0] sm:$0xff] }
  0x86   : > { %3730 = vst [vmem:[#allocation86_spill] sm:$0xff] %v2909_v29  ;;  %3731 = vst [vmem:[#allocation87_spill] sm:$0xff] %v2911_v20  ;;  %v2935_v22 = vsub.f32 %v292_v60, %v425_v28  ;;  %v2937_v30 = vpack.c.bf16 %v427_v2, %v423_v14  ;;  %v433_v31 = vand.u32 4294901760, %v296_v43  ;;  %v480_v63 = vand.u32 4294901760, %v2681_v49 }
  0x87   : > { %3732 = vst [vmem:[#allocation88_spill] sm:$0xff] %v2913_v40  ;;  %3733 = vst [vmem:[#allocation89_spill] sm:$0xff] %v2915_v16  ;;  %1847 = vmatpush1.bf16.msra.mxu1 %v2853_v45  ;;  %2039 = vmatpush1.bf16.msra.mxu0 %v2853_v45  ;;  %v439_v1 = vand.u32 4294901760, %v2924_v0  ;;  %v492_v45 = vand.u32 4294901760, %v2685_v52  ;;  %v2946_v12 = vsub.f32 %v289_v11, %v423_v14  ;;  %v431_v11 = vand.u32 4294901760, %v293_v18 }
  0x88   : > { %3734 = vst [vmem:[#allocation90_spill] sm:$0xff] %v2917_v39  ;;  %3735 = vst [vmem:[#allocation91_spill] sm:$0xff] %v2919_v51  ;;  %1849 = vmatprep.subr.bf16.mxu1 %v2860_v21  ;;  %2041 = vmatprep.subr.bf16.mxu0 %v2860_v21  ;;  %v2948_v60 = vsub.f32 %v291_v50, %v427_v2  ;;  %v2950_v28 = vsub.f32 %v294_v15, %v429_v59  ;;  %v486_v15 = vand.u32 4294901760, %v2687_v53 }
  0x89   : > { %3736 = vst [vmem:[#allocation92_spill] sm:$0xff] %v2924_v0  ;;  %3737 = vst [vmem:[#allocation93_spill] sm:$0xff] %v2928_v19  ;;  %v457_v51 = vsub.f32 %v2669_v42, %v456_v34  ;;  %v440_v39 = vsub.f32 %v2924_v0, %v439_v1  ;;  %v469_v21 = vsub.f32 %v2675_v46, %v468_v58  ;;  %1181 = vmatprep.mubr.f32.mxu0 %v439_v1 }
  0x8a   : > { %3738 = vst [vmem:[#allocation94_spill] sm:$0xff] %v2933_v25  ;;  %3739 = vst [vmem:[#allocation95_spill] sm:$0xff] %v2935_v22  ;;  %v295_v22 = vld [vmem:[%s2611_s29 + $0x1f0] sm:$0xff]  ;;  %v463_v29 = vsub.f32 %v2677_v47, %v462_v36  ;;  %v475_v50 = vsub.f32 %v2679_v48, %v474_v41  ;;  %v498_v14 = vand.u32 4294901760, %v2689_v56  ;;  %v481_v40 = vsub.f32 %v2681_v49, %v480_v63 }
  0x8b   : > { %3740 = vst [vmem:[#allocation96_spill] sm:$0xff] %v2937_v30  ;;  %3741 = vst [vmem:[#allocation97_spill] sm:$0xff] %v2948_v60  ;;  %1851 = vmatpush1.bf16.msra.mxu1 %v2873_v38  ;;  %2043 = vmatpush1.bf16.msra.mxu0 %v2873_v38  ;;  %v435_v1 = vand.u32 4294901760, %v295_v22  ;;  %v441_v2 = vand.u32 4294901760, %v440_v39  ;;  %v493_v0 = vsub.f32 %v2685_v52, %v492_v45  ;;  %v458_v48 = vand.u32 4294901760, %v457_v51 }
  0x8c   : > { %3742 = vst [vmem:[#allocation98_spill] sm:$0xff] %v2950_v28  ;;  %1853 = vmatprep.subr.bf16.mxu1 %v2877_v3  ;;  %2045 = vmatprep.subr.bf16.mxu0 %v2877_v3  ;;  %v2967_v47 = vpack.c.bf16 %v433_v31, %v429_v59  ;;  %v2969_v38 = vsub.f32 %v296_v43, %v433_v31  ;;  %v470_v42 = vand.u32 4294901760, %v469_v21  ;;  %v3745_v28 = vand.u32 4294901760, %v2928_v19 }
  0x8d   : > { %v2971_v46 = vsub.f32 %v293_v18, %v431_v11  ;;  %442 = vmatprep.mubr.f32.mxu1 %v441_v2  ;;  %v464_v3 = vand.u32 4294901760, %v463_v29  ;;  %v504_v39 = vand.u32 4294901760, %v2691_v57  ;;  %v476_v59 = vand.u32 4294901760, %v475_v50 }
  0x8e   : > { %3743 = vst [vmem:[#allocation99_spill] sm:$0xff] %v2967_v47  ;;  %v2976_v60 = vsub.f32 %v2928_v19, %v3745_v28  ;;  %v487_v43 = vsub.f32 %v2687_v53, %v486_v15  ;;  %v499_v31 = vsub.f32 %v2689_v56, %v498_v14  ;;  %v516_v51 = vand.u32 4294901760, %v2698_v61 }
  0x8f   : > { %3744 = vst [vmem:[#allocation100_spill] sm:$0xff] %v2971_v46  ;;  %1855 = vmatpush1.bf16.msra.mxu1 %v2889_v37  ;;  %2047 = vmatpush1.bf16.msra.mxu0 %v2889_v37  ;;  %v2986_v21 = vpack.c.bf16 %v435_v1, %v431_v11  ;;  %v482_v29 = vand.u32 4294901760, %v481_v40  ;;  %v494_v18 = vand.u32 4294901760, %v493_v0  ;;  %v510_v28 = vand.u32 4294901760, %v2708_v4 }
  0x90   : > { %1857 = vmatprep.subr.bf16.mxu1 %v2896_v13  ;;  %2049 = vmatprep.subr.bf16.mxu0 %v2896_v13  ;;  %v2989_v2 = vsub.f32 %v295_v22, %v435_v1  ;;  %v2060_v37 = vpack.c.bf16 %v468_v58, %v456_v34  ;;  %v2991_v50 = vpack.c.bf16 %v474_v41, %v462_v36  ;;  %v522_v46 = vand.u32 4294901760, %v2711_v5 }
  0x91   : > { %3746 = vst [vmem:[#allocation101_spill] sm:$0xff] %v2986_v21  ;;  %v1868_v56 = vpack.c.bf16 %v470_v42, %v458_v48  ;;  %v447_v53 = vand.u32 4294901760, %v2976_v60  ;;  %v2995_v52 = vpack.c.bf16 %v492_v45, %v480_v63  ;;  %v505_v13 = vsub.f32 %v2691_v57, %v504_v39 }
  0x92   : > { %3747 = vst [vmem:[#allocation102_spill] sm:$0xff] %v2989_v2  ;;  %v1870_v40 = vpack.c.bf16 %v476_v59, %v464_v3  ;;  %v488_v0 = vand.u32 4294901760, %v487_v43  ;;  %v500_v22 = vand.u32 4294901760, %v499_v31  ;;  %v517_v34 = vsub.f32 %v2698_v61, %v516_v51 }
  0x93   : > { %1859 = vmatpush1.bf16.msra.mxu1 %v2911_v20  ;;  %2051 = vmatpush1.bf16.msra.mxu0 %v2911_v20  ;;  %v1872_v42 = vpack.c.bf16 %v494_v18, %v482_v29  ;;  %v3003_v48 = vpack.c.bf16 %v498_v14, %v486_v15  ;;  %v511_v45 = vsub.f32 %v2708_v4, %v510_v28  ;;  %v528_v63 = vand.u32 4294901760, %v2714_v6 }
  0x94   : > { %1861 = vmatprep.subr.bf16.mxu1 %v2933_v25  ;;  %2053 = vmatprep.subr.bf16.mxu0 %v2933_v25  ;;  %v523_v58 = vsub.f32 %v2711_v5, %v522_v46  ;;  %v540_v36 = vand.u32 4294901760, %v2717_v7  ;;  %v534_v3 = vand.u32 4294901760, %v2719_v8  ;;  %v546_v41 = vand.u32 4294901760, %v2721_v9 }
  0x95   : > { %v506_v60 = vand.u32 4294901760, %v505_v13  ;;  %v552_v11 = vand.u32 4294901760, %v2723_v10  ;;  %v564_v1 = vand.u32 4294901760, %v2734_v23  ;;  %v558_v15 = vand.u32 4294901760, %v2737_v24 }
  0x96   : > { %v1874_v14 = vpack.c.bf16 %v500_v22, %v488_v0  ;;  %v518_v59 = vand.u32 4294901760, %v517_v34  ;;  %v3016_v43 = vpack.c.bf16 %v516_v51, %v504_v39  ;;  %v570_v31 = vand.u32 4294901760, %v2741_v26 }
  0x97   : > { %1863 = vmatpush1.bf16.msra.mxu1 %v2937_v30  ;;  %2055 = vmatpush1.bf16.msra.mxu0 %v2937_v30  ;;  %v512_v13 = vand.u32 4294901760, %v511_v45  ;;  %v529_v29 = vsub.f32 %v2714_v6, %v528_v63  ;;  %v576_v18 = vand.u32 4294901760, %v2743_v27  ;;  %v588_v25 = vand.u32 4294901760, %v2747_v33 }
  0x98   : > { %1865 = vmatprep.subr.bf16.mxu1 %v2967_v47  ;;  %2057 = vmatprep.subr.bf16.mxu0 %v2967_v47  ;;  %v524_v20 = vand.u32 4294901760, %v523_v58  ;;  %v541_v30 = vsub.f32 %v2717_v7, %v540_v36  ;;  %v535_v0 = vsub.f32 %v2719_v8, %v534_v3  ;;  %v547_v39 = vsub.f32 %v2721_v9, %v546_v41 }
  0x99   : > { %v3027_v51 = vpack.c.bf16 %v522_v46, %v510_v28  ;;  %v553_v22 = vsub.f32 %v2723_v10, %v552_v11  ;;  %v565_v34 = vsub.f32 %v2734_v23, %v564_v1  ;;  %v559_v45 = vsub.f32 %v2737_v24, %v558_v15 }
  0x9a   : > { %v3034_v47 = vpack.c.bf16 %v540_v36, %v528_v63  ;;  %v571_v58 = vsub.f32 %v2741_v26, %v570_v31  ;;  %v582_v2 = vand.u32 4294901760, %v2749_v35  ;;  %v594_v9 = vand.u32 4294901760, %v2757_v44 }
  0x9b   : > { %1867 = vmatpush1.bf16.msra.mxu1 %v2986_v21  ;;  %2059 = vmatpush1.bf16.msra.mxu0 %v2986_v21  ;;  %v1876_v46 = vpack.c.bf16 %v518_v59, %v506_v60  ;;  %v530_v28 = vand.u32 4294901760, %v529_v29  ;;  %v577_v23 = vsub.f32 %v2743_v27, %v576_v18  ;;  %v589_v24 = vsub.f32 %v2747_v33, %v588_v25  ;;  %v3749_v29 = vld [vmem:[#allocation44_spill] sm:$0xff] }
  0x9c   : > { %1869 = vmatprep.subr.bf16.mxu1 %v1868_v56  ;;  %2061 = vmatprep.subr.bf16.mxu0 %v2060_v37  ;;  %v1878_v10 = vpack.c.bf16 %v524_v20, %v512_v13  ;;  %v542_v8 = vand.u32 4294901760, %v541_v30  ;;  %v536_v7 = vand.u32 4294901760, %v535_v0  ;;  %v548_v21 = vand.u32 4294901760, %v547_v39 }
  0x9d   : > { %v3748_v63 = vand.u32 4294901760, %v2928_v19  ;;  %v554_v36 = vand.u32 4294901760, %v553_v22  ;;  %v566_v26 = vand.u32 4294901760, %v565_v34  ;;  %v560_v6 = vand.u32 4294901760, %v559_v45  ;;  %v3750_v34 = vld [vmem:[#allocation45_spill] sm:$0xff] }
  0x9e   : > { %448 = vmatmul.mubr.f32.vlgmr.msra.gmra.mrb[0].mxu1 %v447_v53  ;;  %v600_v56 = vand.u32 4294901760, %v2767_v54  ;;  %v572_v37 = vand.u32 4294901760, %v571_v58  ;;  %v583_v60 = vsub.f32 %v2749_v35, %v582_v2  ;;  %v595_v20 = vsub.f32 %v2757_v44, %v594_v9  ;;  %v3760_v19 = vld [vmem:[#allocation61_spill] sm:$0xff] }
  0x9f   : > { %1185 = vmatmul.mubr.f32.vlgmr.msra.gmra.mrb[0].mxu0 %v3748_v63  ;;  %1871 = vmatpush1.bf16.msra.mxu1 %v1870_v40  ;;  %v612_v30 = vand.u32 4294901760, %v2769_v55  ;;  %v2074_v53 = vpack.c.bf16 %v546_v41, %v534_v3  ;;  %v578_v59 = vand.u32 4294901760, %v577_v23  ;;  %v590_v13 = vand.u32 4294901760, %v589_v24  ;;  %v3756_v63 = vld [vmem:[#allocation54_spill] sm:$0xff] }
  0xa0   : > { %2063 = vmatpush1.bf16.msra.mxu0 %v2991_v50  ;;  %1873 = vmatprep.subr.bf16.mxu1 %v1872_v42  ;;  %v606_v0 = vand.u32 4294901760, %v3749_v29  ;;  %v1880_v39 = vpack.c.bf16 %v542_v8, %v530_v28  ;;  %v1882_v22 = vpack.c.bf16 %v548_v21, %v536_v7  ;;  %v2076_v40 = vpack.c.bf16 %v564_v1, %v552_v11  ;;  %v3752_v1 = vld [vmem:[#allocation48_spill] sm:$0xff] }
  0xa1   : > { %2065 = vmatprep.subr.bf16.mxu0 %v2995_v52  ;;  %v618_v50 = vand.u32 4294901760, %v3750_v34  ;;  %839 = vmatprep.mubr.f32.mxu1 %v2915_v16  ;;  %v1884_v45 = vpack.c.bf16 %v566_v26, %v554_v36  ;;  %v3053_v58 = vpack.c.bf16 %v570_v31, %v558_v15  ;;  %v3055_v42 = vpack.c.bf16 %v588_v25, %v576_v18  ;;  %v3751_v25 = vld [vmem:[#allocation47_spill] sm:$0xff] }
  0xa2   : > { %1448 = vmatprep.mubr.f32.mxu0 %v2915_v16  ;;  %v601_v52 = vsub.f32 %v2767_v54, %v600_v56  ;;  %v1886_v23 = vpack.c.bf16 %v572_v37, %v560_v6  ;;  %v584_v8 = vand.u32 4294901760, %v583_v60  ;;  %v596_v7 = vand.u32 4294901760, %v595_v20  ;;  %v3757_v37 = vld [vmem:[#allocation55_spill] sm:$0xff]  ;;  %v3758_v20 = vld [vmem:[#allocation57_spill] sm:$0xff] }
  0xa3   : > { %1875 = vmatpush1.bf16.msra.mxu1 %v1874_v14  ;;  %v613_v24 = vsub.f32 %v2769_v55, %v612_v30  ;;  %v1888_v21 = vpack.c.bf16 %v590_v13, %v578_v59  ;;  %v3061_v3 = vpack.c.bf16 %v594_v9, %v582_v2  ;;  %v607_v26 = vsub.f32 %v3749_v29, %v606_v0  ;;  %v3754_v14 = vld [vmem:[#allocation51_spill] sm:$0xff]  ;;  %v3762_v29 = vld [vmem:[#allocation64_spill] sm:$0xff]  ;;  %v3763_v55 = vld [vmem:[#allocation66_spill] sm:$0xff] }
  0xa4   : > { %2067 = vmatpush1.bf16.msra.mxu0 %v3003_v48  ;;  %1877 = vmatprep.subr.bf16.mxu1 %v1876_v46  ;;  %v624_v41 = vand.u32 4294901760, %v3751_v25  ;;  %v619_v11 = vsub.f32 %v3750_v34, %v618_v50  ;;  %v636_v15 = vand.u32 4294901760, %v3752_v1  ;;  %v3753_v48 = vld [vmem:[#allocation50_spill] sm:$0xff]  ;;  %v642_v31 = vand.u32 4294901760, %v3754_v14  ;;  %v3755_v46 = vld [vmem:[#allocation53_spill] sm:$0xff] }
  0xa5   : > { %2069 = vmatprep.subr.bf16.mxu0 %v3016_v43  ;;  %v630_v6 = vand.u32 4294901760, %v3753_v48  ;;  %v602_v18 = vand.u32 4294901760, %v601_v52  ;;  %v3069_v28 = vpack.c.bf16 %v612_v30, %v600_v56  ;;  %v648_v43 = vand.u32 4294901760, %v3755_v46  ;;  %v3759_v30 = vld [vmem:[#allocation60_spill] sm:$0xff] }
  0xa6   : > { %v660_v9 = vand.u32 4294901760, %v3756_v63  ;;  %v1890_v2 = vpack.c.bf16 %v596_v7, %v584_v8  ;;  %v614_v36 = vand.u32 4294901760, %v613_v24  ;;  %v654_v60 = vand.u32 4294901760, %v3757_v37 }
  0xa7   : > { %1879 = vmatpush1.bf16.msra.mxu1 %v1878_v10  ;;  %v666_v59 = vand.u32 4294901760, %v3758_v20  ;;  %v608_v13 = vand.u32 4294901760, %v607_v26  ;;  %v625_v56 = vsub.f32 %v3751_v25, %v624_v41  ;;  %v672_v52 = vand.u32 4294901760, %v3759_v30  ;;  %v3761_v25 = vld [vmem:[#allocation63_spill] sm:$0xff] }
  0xa8   : > { %2071 = vmatpush1.bf16.msra.mxu0 %v3027_v51  ;;  %1881 = vmatprep.subr.bf16.mxu1 %v1880_v39  ;;  %v684_v16 = vand.u32 4294901760, %v3760_v19  ;;  %v620_v34 = vand.u32 4294901760, %v619_v11  ;;  %v637_v10 = vsub.f32 %v3752_v1, %v636_v15  ;;  %v631_v51 = vsub.f32 %v3753_v48, %v630_v6 }
  0xa9   : > { %2073 = vmatprep.subr.bf16.mxu0 %v3034_v47  ;;  %v643_v8 = vsub.f32 %v3754_v14, %v642_v31  ;;  %v3083_v7 = vpack.c.bf16 %v618_v50, %v606_v0  ;;  %v3085_v24 = vpack.c.bf16 %v636_v15, %v624_v41  ;;  %v649_v47 = vsub.f32 %v3755_v46, %v648_v43 }
  0xaa   : > { %v661_v39 = vsub.f32 %v3756_v63, %v660_v9  ;;  %v655_v26 = vsub.f32 %v3757_v37, %v654_v60  ;;  %v667_v11 = vsub.f32 %v3758_v20, %v666_v59  ;;  %v678_v1 = vand.u32 4294901760, %v3761_v25 }
  0xab   : > { %1883 = vmatpush1.bf16.msra.mxu1 %v1882_v22  ;;  %v690_v48 = vand.u32 4294901760, %v3762_v29  ;;  %v1892_v0 = vpack.c.bf16 %v614_v36, %v602_v18  ;;  %v626_v50 = vand.u32 4294901760, %v625_v56  ;;  %v673_v41 = vsub.f32 %v3759_v30, %v672_v52  ;;  %v3811_v30 = vld [vmem:[#allocation74_spill] sm:$0xff] }
  0xac   : > { %2075 = vmatpush1.bf16.msra.mxu0 %v2074_v53  ;;  %1885 = vmatprep.subr.bf16.mxu1 %v1884_v45  ;;  %v685_v15 = vsub.f32 %v3760_v19, %v684_v16  ;;  %v1894_v46 = vpack.c.bf16 %v620_v34, %v608_v13  ;;  %v638_v63 = vand.u32 4294901760, %v637_v10  ;;  %v632_v22 = vand.u32 4294901760, %v631_v51  ;;  %v3812_v19 = vld [vmem:[#allocation76_spill] sm:$0xff] }
  0xad   : > { %2077 = vmatprep.subr.bf16.mxu0 %v2076_v40  ;;  %v644_v53 = vand.u32 4294901760, %v643_v8  ;;  %v3095_v14 = vpack.c.bf16 %v642_v31, %v630_v6  ;;  %v650_v37 = vand.u32 4294901760, %v649_v47  ;;  %v662_v20 = vand.u32 4294901760, %v661_v39  ;;  %v3764_v6 = vld [vmem:[#allocation67_spill] sm:$0xff]  ;;  %v3765_v8 = vld [vmem:[#allocation70_spill] sm:$0xff] }
  0xae   : > { %v696_v54 = vand.u32 4294901760, %v3763_v55  ;;  %v656_v40 = vand.u32 4294901760, %v655_v26  ;;  %v668_v45 = vand.u32 4294901760, %v667_v11  ;;  %v679_v18 = vsub.f32 %v3761_v25, %v678_v1  ;;  %v3814_v25 = vld [vmem:[#allocation79_spill] sm:$0xff] }
  0xaf   : > { %1887 = vmatpush1.bf16.msra.mxu1 %v1886_v23  ;;  %v691_v36 = vsub.f32 %v3762_v29, %v690_v48  ;;  %v674_v34 = vand.u32 4294901760, %v673_v41  ;;  %v686_v13 = vand.u32 4294901760, %v685_v15  ;;  %v708_v31 = vand.u32 4294901760, %v3764_v6  ;;  %v3815_v29 = vld [vmem:[#allocation81_spill] sm:$0xff] }
  0xb0   : > { %2079 = vmatpush1.bf16.msra.mxu0 %v3053_v58  ;;  %1889 = vmatprep.subr.bf16.mxu1 %v1888_v21  ;;  %v702_v56 = vand.u32 4294901760, %v2855_v17  ;;  %v1896_v10 = vpack.c.bf16 %v638_v63, %v626_v50  ;;  %v1898_v51 = vpack.c.bf16 %v644_v53, %v632_v22  ;;  %v2092_v23 = vpack.c.bf16 %v660_v9, %v648_v43  ;;  %v3769_v50 = vld [vmem:[#allocation76_spill] sm:$0xff]  ;;  %v3770_v53 = vld [vmem:[#allocation81_spill] sm:$0xff] }
  0xb1   : > { %2081 = vmatprep.subr.bf16.mxu0 %v3055_v42  ;;  %v714_v58 = vand.u32 4294901760, %v3765_v8  ;;  %v1900_v47 = vpack.c.bf16 %v662_v20, %v650_v37  ;;  %v2094_v39 = vpack.c.bf16 %v666_v59, %v654_v60  ;;  %v3105_v26 = vpack.c.bf16 %v684_v16, %v672_v52  ;;  %v3766_v37 = vld [vmem:[#allocation72_spill] sm:$0xff] }
  0xb2   : > { %v697_v11 = vsub.f32 %v3763_v55, %v696_v54  ;;  %v1902_v42 = vpack.c.bf16 %v668_v45, %v656_v40  ;;  %v680_v21 = vand.u32 4294901760, %v679_v18  ;;  %v692_v41 = vand.u32 4294901760, %v691_v36  ;;  %v3771_v45 = vld [vmem:[#allocation82_spill] sm:$0xff] }
  0xb3   : > { %1891 = vmatpush1.bf16.msra.mxu1 %v1890_v2  ;;  %v3109_v15 = vpack.c.bf16 %v690_v48, %v678_v1  ;;  %v1904_v43 = vpack.c.bf16 %v686_v13, %v674_v34  ;;  %v709_v63 = vsub.f32 %v3764_v6, %v708_v31  ;;  %v703_v9 = vsub.f32 %v2855_v17, %v702_v56  ;;  %v3767_v2 = vld [vmem:[#allocation73_spill] sm:$0xff]  ;;  %v3772_v13 = vld [vmem:[#allocation84_spill] sm:$0xff] }
  0xb4   : > { %2083 = vmatpush1.bf16.msra.mxu0 %v3061_v3  ;;  %1893 = vmatprep.subr.bf16.mxu1 %v1892_v0  ;;  %v715_v16 = vsub.f32 %v3765_v8, %v714_v58  ;;  %v720_v60 = vand.u32 4294901760, %v3766_v37  ;;  %v732_v20 = vand.u32 4294901760, %v3767_v2  ;;  %v3768_v3 = vld [vmem:[#allocation74_spill] sm:$0xff]  ;;  %v698_v52 = vand.u32 4294901760, %v697_v11 }
  0xb5   : > { %2085 = vmatprep.subr.bf16.mxu0 %v3069_v28  ;;  %v726_v59 = vand.u32 4294901760, %v3768_v3  ;;  %v738_v1 = vand.u32 4294901760, %v3769_v50  ;;  %v744_v48 = vand.u32 4294901760, %v2882_v32  ;;  %v756_v28 = vand.u32 4294901760, %v2884_v62  ;;  %v3773_v8 = vld [vmem:[#allocation86_spill] sm:$0xff] }
  0xb6   : > { %v1906_v0 = vpack.c.bf16 %v692_v41, %v680_v21  ;;  %v3122_v22 = vpack.c.bf16 %v708_v31, %v696_v54  ;;  %v750_v40 = vand.u32 4294901760, %v3770_v53  ;;  %v762_v18 = vand.u32 4294901760, %v3771_v45 }
  0xb7   : > { %1895 = vmatpush1.bf16.msra.mxu1 %v1894_v46  ;;  %v710_v36 = vand.u32 4294901760, %v709_v63  ;;  %v704_v34 = vand.u32 4294901760, %v703_v9  ;;  %v768_v11 = vand.u32 4294901760, %v3772_v13  ;;  %v780_v17 = vand.u32 4294901760, %v3773_v8 }
  0xb8   : > { %2087 = vmatpush1.bf16.msra.mxu0 %v3083_v7  ;;  %1897 = vmatprep.subr.bf16.mxu1 %v1896_v10  ;;  %v716_v6 = vand.u32 4294901760, %v715_v16  ;;  %v721_v46 = vsub.f32 %v3766_v37, %v720_v60  ;;  %v733_v7 = vsub.f32 %v3767_v2, %v732_v20  ;;  %v727_v54 = vsub.f32 %v3768_v3, %v726_v59  ;;  %v3774_v16 = vld [vmem:[#allocation88_spill] sm:$0xff] }
  0xb9   : > { %2089 = vmatprep.subr.bf16.mxu0 %v3085_v24  ;;  %v3132_v31 = vpack.c.bf16 %v714_v58, %v702_v56  ;;  %v739_v21 = vsub.f32 %v3769_v50, %v738_v1  ;;  %v745_v10 = vsub.f32 %v2882_v32, %v744_v48  ;;  %v757_v24 = vsub.f32 %v2884_v62, %v756_v28  ;;  %v3775_v50 = vld [vmem:[#allocation90_spill] sm:$0xff] }
  0xba   : > { %v3138_v41 = vpack.c.bf16 %v732_v20, %v720_v60  ;;  %v751_v63 = vsub.f32 %v3770_v53, %v750_v40  ;;  %v763_v9 = vsub.f32 %v3771_v45, %v762_v18  ;;  %v3636_v2 = vand.u32 4294901760, %v3774_v16 }
  0xbb   : > { %1899 = vmatpush1.bf16.msra.mxu1 %v1898_v51  ;;  %v1908_v56 = vpack.c.bf16 %v710_v36, %v698_v52  ;;  %v769_v58 = vsub.f32 %v3772_v13, %v768_v11  ;;  %v781_v32 = vsub.f32 %v3773_v8, %v780_v17  ;;  %v1910_v51 = vpack.c.bf16 %v716_v6, %v704_v34  ;;  %v3776_v36 = vld [vmem:[#allocation91_spill] sm:$0xff] }
  0xbc   : > { %2091 = vmatpush1.bf16.msra.mxu0 %v3095_v14  ;;  %1901 = vmatprep.subr.bf16.mxu1 %v1900_v47  ;;  %v722_v3 = vand.u32 4294901760, %v721_v46  ;;  %v734_v14 = vand.u32 4294901760, %v733_v7  ;;  %v728_v60 = vand.u32 4294901760, %v727_v54  ;;  %v740_v20 = vand.u32 4294901760, %v739_v21  ;;  %v3779_v21 = vld [vmem:[#allocation97_spill] sm:$0xff] }
  0xbd   : > { %2093 = vmatprep.subr.bf16.mxu0 %v2092_v23  ;;  %v3146_v37 = vpack.c.bf16 %v738_v1, %v726_v59  ;;  %v746_v53 = vand.u32 4294901760, %v745_v10  ;;  %v758_v45 = vand.u32 4294901760, %v757_v24  ;;  %v752_v47 = vand.u32 4294901760, %v751_v63 }
  0xbe   : > { %v764_v23 = vand.u32 4294901760, %v763_v9  ;;  %v3151_v52 = vsub.f32 %v3774_v16, %v3636_v2  ;;  %v3635_v62 = vand.u32 4294901760, %v3776_v36  ;;  %v770_v6 = vand.u32 4294901760, %v769_v58  ;;  %v3806_v2 = vld [vmem:[#allocation67_spill] sm:$0xff] }
  0xbf   : > { %1903 = vmatpush1.bf16.msra.mxu1 %v1902_v42  ;;  %v782_v34 = vand.u32 4294901760, %v781_v32  ;;  %v3777_v59 = vand.u32 4294901760, %v3775_v50  ;;  %v1912_v46 = vpack.c.bf16 %v734_v14, %v722_v3  ;;  %v2108_v7 = vpack.c.bf16 %v756_v28, %v744_v48  ;;  %v3796_v14 = vld [vmem:[#allocation45_spill] sm:$0xff] }
  0xc0   : > { %2095 = vmatpush1.bf16.msra.mxu0 %v2094_v39  ;;  %1905 = vmatprep.subr.bf16.mxu1 %v1904_v43  ;;  %v3778_v39 = vld [vmem:[#allocation95_spill] sm:$0xff]  ;;  %v3633_v54 = vand.u32 4294901760, %v2946_v12  ;;  %v3632_v10 = vand.u32 4294901760, %v3779_v21  ;;  %v1914_v24 = vpack.c.bf16 %v740_v20, %v728_v60  ;;  %v3163_v63 = vpack.c.bf16 %v762_v18, %v750_v40  ;;  %v3783_v18 = vld [vmem:[#allocation24_spill] sm:$0xff]  ;;  %v3793_v60 = vld [vmem:[#allocation41_spill] sm:$0xff] }
  0xc1   : > { %2097 = vmatprep.subr.bf16.mxu0 %v3105_v26  ;;  %v3158_v1 = vsub.f32 %v3775_v50, %v3777_v59  ;;  %v3634_v42 = vand.u32 4294901760, %v3778_v39  ;;  %v3165_v43 = vpack.c.bf16 %v780_v17, %v768_v11  ;;  %v3780_v26 = vld [vmem:[#allocation98_spill] sm:$0xff]  ;;  %v1916_v9 = vpack.c.bf16 %v758_v45, %v746_v53  ;;  %v3782_v45 = vld [vmem:[#allocation23_spill] sm:$0xff]  ;;  %v3809_v40 = vld [vmem:[#allocation72_spill] sm:$0xff] }
  0xc2   : > { %v3631_v32 = vand.u32 4294901760, %v3780_v26  ;;  %v1918_v58 = vpack.c.bf16 %v764_v23, %v752_v47  ;;  %v776_v59 = vand.u32 4294901760, %v3151_v52  ;;  %v3173_v3 = vsub.f32 %v3776_v36, %v3635_v62  ;;  %v3785_v47 = vld [vmem:[#allocation28_spill] sm:$0xff]  ;;  %v3808_v11 = vld [vmem:[#allocation70_spill] sm:$0xff] }
  0xc3   : > { %1907 = vmatpush1.bf16.msra.mxu1 %v1906_v0  ;;  %v1920_v48 = vpack.c.bf16 %v782_v34, %v770_v6  ;;  %v788_v17 = vand.u32 4294901760, %v3158_v1  ;;  %v805_v28 = vsub.f32 %v3778_v39, %v3634_v42  ;;  %v3184_v0 = vsub.f32 %v2946_v12, %v3633_v54  ;;  %v3792_v23 = vld [vmem:[#allocation100_spill] sm:$0xff]  ;;  %v3807_v54 = vld [vmem:[#allocation69_spill] sm:$0xff]  ;;  %v3816_v20 = vld [vmem:[#allocation82_spill] sm:$0xff] }
  0xc4   : > { %2099 = vmatpush1.bf16.msra.mxu0 %v3109_v15  ;;  %1909 = vmatprep.subr.bf16.mxu1 %v1908_v56  ;;  %v3637_v15 = vand.u32 4294901760, %v2969_v38  ;;  %v811_v53 = vsub.f32 %v3779_v21, %v3632_v10  ;;  %v3196_v56 = vsub.f32 %v3780_v26, %v3631_v32  ;;  %v794_v52 = vand.u32 4294901760, %v3173_v3  ;;  %v3794_v32 = vld [vmem:[#allocation42_spill] sm:$0xff]  ;;  %v3795_v62 = vld [vmem:[#allocation44_spill] sm:$0xff]  ;;  %v3810_v6 = vld [vmem:[#allocation73_spill] sm:$0xff] }
  0xc5   : > { %2101 = vmatprep.subr.bf16.mxu0 %v3122_v22  ;;  %v3781_v22 = vld [vmem:[#allocation22_spill] sm:$0xff]  ;;  %v806_v1 = vand.u32 4294901760, %v805_v28  ;;  %v1922_v28 = vpack.c.bf16 %v788_v17, %v776_v59  ;;  %v3817_v42 = vand.u32 4294901760, %v3774_v16  ;;  %v3819_v17 = vand.u32 4294901760, %v3776_v36 }
  0xc6   : > { %v812_v34 = vand.u32 4294901760, %v811_v53  ;;  %v3822_v53 = vand.u32 4294901760, %v3779_v21 }
  0xc7   : > { %1911 = vmatpush1.bf16.msra.mxu1 %v1910_v51  ;;  %v829_v51 = vsub.f32 %v2969_v38, %v3637_v15 }
  0xc8   : > { %2103 = vmatpush1.bf16.msra.mxu0 %v3132_v31  ;;  %1913 = vmatprep.subr.bf16.mxu1 %v1912_v46  ;;  %v822_v31 = vand.u32 4294901760, %v3792_v23  ;;  %v3805_v46 = vld [vmem:[#allocation102_spill] sm:$0xff] }
  0xc9   : > { %2105 = vmatprep.subr.bf16.mxu0 %v3138_v41  ;;  %v3798_v41 = vld [vmem:[#allocation48_spill] sm:$0xff]  ;;  %v834_v10 = vand.u32 4294901760, %v3805_v46  ;;  %v830_v15 = vand.u32 4294901760, %v829_v51  ;;  %v3826_v51 = vld [vmem:[#allocation19_spill] sm:$0xff] }
  0xcb   : > { %1915 = vmatpush1.bf16.msra.mxu1 %v1914_v24  ;;  %v3813_v24 = vld [vmem:[#allocation78_spill] sm:$0xff]  ;;  %v835_v59 = vsub.f32 %v3805_v46, %v834_v10 }
  0xcc   : > { %2107 = vmatpush1.bf16.msra.mxu0 %v3146_v37  ;;  %1917 = vmatprep.subr.bf16.mxu1 %v1916_v9  ;;  %v3818_v37 = vand.u32 4294901760, %v3775_v50  ;;  %v800_v9 = vand.u32 4294901760, %v3184_v0  ;;  %v3821_v0 = vand.u32 4294901760, %v2946_v12 }
  0xcd   : > { %2109 = vmatprep.subr.bf16.mxu0 %v2108_v7  ;;  %v823_v7 = vsub.f32 %v3792_v23, %v822_v31  ;;  %v836_v46 = vand.u32 4294901760, %v835_v59  ;;  %v3830_v59 = vld [vmem:[#allocation85_spill] sm:$0xff] }
  0xce   : > { %v2114_v27 = vpack.c.bf16 %v3818_v37, %v3817_v42  ;;  %v1924_v42 = vpack.c.bf16 %v806_v1, %v794_v52  ;;  %v3820_v37 = vand.u32 4294901760, %v3778_v39  ;;  %v2118_v23 = vpack.c.bf16 %v3822_v53, %v3821_v0  ;;  %v3839_v0 = vld [vmem:[#allocation15_spill] sm:$0xff] }
  0xcf   : > { %1919 = vmatpush1.bf16.msra.mxu1 %v1918_v58  ;;  %v818_v58 = vand.u32 4294901760, %v3196_v56  ;;  %v3823_v52 = vand.u32 4294901760, %v3780_v26  ;;  %v3824_v1 = vand.u32 4294901760, %v2969_v38  ;;  %v3842_v53 = vld [vmem:[#allocation27_spill] sm:$0xff] }
  0xd0   : > { %2111 = vmatpush1.bf16.msra.mxu0 %v3163_v63  ;;  %1921 = vmatprep.subr.bf16.mxu1 %v1920_v48  ;;  %v2116_v3 = vpack.c.bf16 %v3820_v37, %v3819_v17  ;;  %v1926_v63 = vpack.c.bf16 %v812_v34, %v800_v9  ;;  %v824_v48 = vand.u32 4294901760, %v823_v7  ;;  %v3825_v34 = vld [vmem:[#allocation17_spill] sm:$0xff]  ;;  %v3827_v7 = vld [vmem:[#allocation20_spill] sm:$0xff]  ;;  %v3836_v37 = vpack.c.bf16 %v3783_v18, %v3782_v45  ;;  %v3844_v45 = vld [vmem:[#allocation18_spill] sm:$0xff] }
  0xd1   : > { %2113 = vmatprep.subr.bf16.mxu0 %v3165_v43  ;;  %v1928_v43 = vpack.c.bf16 %v830_v15, %v818_v58  ;;  %v2120_v17 = vpack.c.bf16 %v3824_v1, %v3823_v52  ;;  %v1932_v9 = vpack.c.bf16 %v3826_v51, %v3825_v34  ;;  %v3829_v15 = vld [vmem:[#allocation11_spill] sm:$0xff]  ;;  %v3837_v58 = vld [vmem:[#allocation14_spill] sm:$0xff]  ;;  %v3857_v34 = vld [vmem:[#allocation37_spill] sm:$0xff] }
  0xd2   : > { %v1930_v56 = vpack.c.bf16 %v836_v46, %v824_v48  ;;  %v3834_v46 = vld [vmem:[#allocation92_spill] sm:$0xff]  ;;  %v3843_v48 = vpack.c.bf16 %v3785_v47, %v3842_v53  ;;  %v3845_v18 = vld [vmem:[#allocation30_spill] sm:$0xff]  ;;  %v3850_v1 = vld [vmem:[#allocation31_spill] sm:$0xff]  ;;  %v3858_v51 = vpack.c.bf16 %v2747_v33, %v3857_v34 }
  0xd3   : > { %1923 = vmatpush1.bf16.msra.mxu1 %v1922_v28  ;;  %v3828_v28 = vld [vmem:[#allocation21_spill] sm:$0xff]  ;;  %v3856_v47 = vld [vmem:[#allocation32_spill] sm:$0xff]  ;;  %v3865_v33 = vld [vmem:[#allocation43_spill] sm:$0xff] }
  0xd4   : > { %2115 = vmatpush1.bf16.msra.mxu0 %v2114_v27  ;;  %1925 = vmatprep.subr.bf16.mxu1 %v1924_v42  ;;  %v2122_v27 = vpack.c.bf16 %v834_v10, %v822_v31  ;;  %v3832_v10 = vpack.c.bf16 %v3781_v22, %v2681_v49  ;;  %v3833_v31 = vld [vmem:[#allocation13_spill] sm:$0xff]  ;;  %v3840_v49 = vpack.c.bf16 %v2711_v5, %v2708_v4  ;;  %v3841_v22 = vld [vmem:[#allocation16_spill] sm:$0xff]  ;;  %v3852_v4 = vld [vmem:[#allocation26_spill] sm:$0xff] }
  0xd5   : > { %2117 = vmatprep.subr.bf16.mxu0 %v2116_v3  ;;  %v1934_v3 = vpack.c.bf16 %v3828_v28, %v3827_v7  ;;  %v3835_v42 = vld [vmem:[#allocation89_spill] sm:$0xff]  ;;  %v3853_v5 = vld [vmem:[#allocation36_spill] sm:$0xff]  ;;  %v3860_v7 = vpack.c.bf16 %v2757_v44, %v2749_v35  ;;  %v3861_v28 = vld [vmem:[#allocation38_spill] sm:$0xff] }
  0xd6   : > { %v3868_v35 = vld [vmem:[#allocation46_spill] sm:$0xff]  ;;  %v3869_v44 = vld [vmem:[#allocation51_spill] sm:$0xff] }
  0xd7   : > { %1927 = vmatpush1.bf16.msra.mxu1 %v1926_v63  ;;  %v3838_v63 = vpack.c.bf16 %v2698_v61, %v2691_v57  ;;  %v3848_v57 = vld [vmem:[#allocation25_spill] sm:$0xff] }
  0xd8   : > { %2119 = vmatpush1.bf16.msra.mxu0 %v2118_v23  ;;  %1929 = vmatprep.subr.bf16.mxu1 %v1928_v43  ;;  %v3831_v23 = vld [vmem:[#allocation12_spill] sm:$0xff]  ;;  %v3846_v43 = vld [vmem:[#allocation29_spill] sm:$0xff] }
  0xd9   : > { %2121 = vmatprep.subr.bf16.mxu0 %v2120_v17  ;;  %v3847_v52 = vpack.c.bf16 %v3845_v18, %v3846_v43  ;;  %v3849_v61 = vld [vmem:[#allocation33_spill] sm:$0xff]  ;;  %v3886_v18 = vld [vmem:[#allocation63_spill] sm:$0xff] }
  0xda   : > { %v3851_v17 = vpack.c.bf16 %v3849_v61, %v3850_v1  ;;  %v3890_v61 = vld [vmem:[#allocation65_spill] sm:$0xff]  ;;  %v3891_v1 = vpack.c.bf16 %v3808_v11, %v3807_v54  ;;  %v3899_v11 = vpack.c.bf16 %v3816_v20, %v3815_v29  ;;  %v3906_v29 = vld [vmem:[#allocation94_spill] sm:$0xff]  ;;  %v3907_v20 = vpack.c.bf16 %v3779_v21, %v2946_v12 }
  0xdb   : > { %1931 = vmatpush1.bf16.msra.mxu1 %v1930_v56  ;;  %v3854_v56 = vld [vmem:[#allocation34_spill] sm:$0xff]  ;;  %v3898_v54 = vld [vmem:[#allocation77_spill] sm:$0xff]  ;;  %v3916_v12 = vlaneseq }
  0xdc   : > { %2123 = vmatpush1.bf16.msra.mxu0 %v2122_v27  ;;  %1933 = vmatprep.subr.bf16.mxu1 %v1932_v9  ;;  %v3855_v27 = vpack.c.bf16 %v3853_v5, %v3854_v56  ;;  %v3859_v9 = vld [vmem:[#allocation35_spill] sm:$0xff]  ;;  %v3895_v56 = vpack.c.bf16 %v3812_v19, %v3811_v30  ;;  %v3903_v30 = vpack.c.bf16 %v3775_v50, %v3774_v16  ;;  %v3911_v16 = vld [vmem:[#allocation102_spill] sm:$0xff] }
  0xdd   : > { %2125 = vmatprep.subr.bf16.mxu0 %v3829_v15  ;;  %v3863_v15 = vld [vmem:[#allocation39_spill] sm:$0xff]  ;;  %vm3418_vm0 = vcmp.lt.s32.totalorder %v3916_v12, 256 }
  0xde   : > { %841 = vmatmul.mubr.f32.vlgmr.msra.gmra.mrb[0].mxu1 %v3830_v59  ;;  %v3894_v5 = vld [vmem:[#allocation71_spill] sm:$0xff] }
  0xdf   : > { %1450 = vmatmul.mubr.f32.vlgmr.msra.gmra.mrb[0].mxu0 %v3830_v59  ;;  %1935 = vmatpush1.bf16.msra.mxu1 %v1934_v3  ;;  %v3862_v3 = vpack.c.bf16 %v3794_v32, %v3793_v60  ;;  %v3872_v32 = vld [vmem:[#allocation49_spill] sm:$0xff]  ;;  %v3873_v60 = vld [vmem:[#allocation54_spill] sm:$0xff]  ;;  %v3902_v19 = vld [vmem:[#allocation83_spill] sm:$0xff] }
  0xe0   : > { %2127 = vmatpush1.bf16.msra.mxu0 %v3831_v23  ;;  %1937 = vmatprep.subr.bf16.mxu1 %v3832_v10  ;;  %v3864_v23 = vpack.c.bf16 %v3796_v14, %v3795_v62  ;;  %v3866_v10 = vld [vmem:[#allocation47_spill] sm:$0xff]  ;;  %v3876_v62 = vld [vmem:[#allocation52_spill] sm:$0xff]  ;;  %v3877_v14 = vld [vmem:[#allocation57_spill] sm:$0xff] }
  0xe1   : > { %2129 = vmatprep.subr.bf16.mxu0 %v3833_v31  ;;  %1041 = vmatprep.mubr.f32.mxu1 %v3834_v46  ;;  %v3867_v31 = vpack.c.bf16 %v3798_v41, %v3866_v10  ;;  %v3870_v46 = vld [vmem:[#allocation50_spill] sm:$0xff]  ;;  %v3880_v41 = vld [vmem:[#allocation56_spill] sm:$0xff]  ;;  %v3910_v50 = vld [vmem:[#allocation99_spill] sm:$0xff] }
  0xe2   : > { %1585 = vmatprep.mubr.f32.mxu0 %v3835_v42  ;;  %v3871_v42 = vpack.c.bf16 %v3869_v44, %v3870_v46 }
  0xe3   : > { %1939 = vmatpush1.bf16.msra.mxu1 %v3836_v37  ;;  %v3874_v37 = vld [vmem:[#allocation53_spill] sm:$0xff] }
  0xe4   : > { %2131 = vmatpush1.bf16.msra.mxu0 %v3837_v58  ;;  %1941 = vmatprep.subr.bf16.mxu1 %v3838_v63  ;;  %v3875_v58 = vpack.c.bf16 %v3873_v60, %v3874_v37  ;;  %v3878_v63 = vld [vmem:[#allocation55_spill] sm:$0xff] }
  0xe5   : > { %2133 = vmatprep.subr.bf16.mxu0 %v3839_v0  ;;  %v3879_v0 = vpack.c.bf16 %v3877_v14, %v3878_v63 }
  0xe7   : > { %1943 = vmatpush1.bf16.msra.mxu1 %v3840_v49  ;;  %v3881_v49 = vld [vmem:[#allocation61_spill] sm:$0xff] }
  0xe8   : > { %2135 = vmatpush1.bf16.msra.mxu0 %v3841_v22  ;;  %1945 = vmatprep.subr.bf16.mxu1 %v3843_v48  ;;  %v3882_v22 = vld [vmem:[#allocation60_spill] sm:$0xff]  ;;  %v3884_v48 = vld [vmem:[#allocation58_spill] sm:$0xff] }
  0xe9   : > { %2137 = vmatprep.subr.bf16.mxu0 %v3844_v45  ;;  %v3883_v53 = vpack.c.bf16 %v3881_v49, %v3882_v22  ;;  %v3885_v45 = vld [vmem:[#allocation64_spill] sm:$0xff] }
  0xea   : > { %v3887_v43 = vpack.c.bf16 %v3885_v45, %v3886_v18 }
  0xeb   : > { %1947 = vmatpush1.bf16.msra.mxu1 %v3847_v52  ;;  %v3888_v52 = vld [vmem:[#allocation62_spill] sm:$0xff] }
  0xec   : > { %2139 = vmatpush1.bf16.msra.mxu0 %v3848_v57  ;;  %1949 = vmatprep.subr.bf16.mxu1 %v3851_v17  ;;  %v3889_v57 = vpack.c.bf16 %v3806_v2, %v3763_v55  ;;  %v3892_v17 = vld [vmem:[#allocation68_spill] sm:$0xff]  ;;  %v3896_v55 = vld [vmem:[#allocation75_spill] sm:$0xff]  ;;  %v3897_v2 = vpack.c.bf16 %v3814_v25, %v3813_v24  ;;  %v3905_v24 = vpack.c.bf16 %v3778_v39, %v3776_v36  ;;  %v3914_v36 = vld [vmem:[#allocation101_spill] sm:$0xff] }
  0xed   : > { %2141 = vmatprep.subr.bf16.mxu0 %v3852_v4  ;;  %v3893_v4 = vpack.c.bf16 %v3810_v6, %v3809_v40  ;;  %v3900_v40 = vld [vmem:[#allocation80_spill] sm:$0xff]  ;;  %v3901_v6 = vpack.c.bf16 %v3773_v8, %v3772_v13  ;;  %v3904_v25 = vld [vmem:[#allocation87_spill] sm:$0xff]  ;;  %v3909_v13 = vpack.c.bf16 %v2969_v38, %v3780_v26  ;;  %v3915_v39 = vld [vmem:[#allocation93_spill] sm:$0xff]  ;;  %v2423_v38 = vmov 0.0  }
  0xee   : > { %v3908_v8 = vld [vmem:[#allocation96_spill] sm:$0xff]  ;;  %231 = vst.msk [vmem:[%s3424_s21] sm:$0x3] %vm3418_vm0, %v2423_v38  ;;  %v2424_v26 = vmov 1966171168  }
  0xef   : > { %1951 = vmatpush1.bf16.msra.mxu1 %v3855_v27  ;;  %v3912_v27 = vld [vmem:[#allocation100_spill] sm:$0xff]  ;;  %v1597_v34 = vunpack.c.l.s4 %v2424_v26 }
  0xf0   : > { %2143 = vmatpush1.bf16.msra.mxu0 %v3856_v47  ;;  %1953 = vmatprep.subr.bf16.mxu1 %v3858_v51  ;;  %v3913_v47 = vpack.c.bf16 %v3911_v16, %v3912_v27 }
  0xf1   : > { %2145 = vmatprep.subr.bf16.mxu0 %v3859_v9  ;;  %v1598_v51 = vunpack.c.0.s8 %v1597_v34 }
  0xf3   : > { %1955 = vmatpush1.bf16.msra.mxu1 %v3860_v7 }
  0xf4   : > { %2147 = vmatpush1.bf16.msra.mxu0 %v3861_v28  ;;  %1957 = vmatprep.subr.bf16.mxu1 %v3862_v3 }
  0xf5   : > { %2149 = vmatprep.subr.bf16.mxu0 %v3863_v15 }
  0xf7   : > { %1959 = vmatpush1.bf16.msra.mxu1 %v3864_v23  ;;  %v3919_v23 = vld [vmem:[#allocation40_spill] sm:$0xff] }
  0xf8   : > { %2151 = vmatpush1.bf16.msra.mxu0 %v3865_v33  ;;  %1961 = vmatprep.subr.bf16.mxu1 %v3867_v31  ;;  %v1601_v33 = vsub.s32 %v1598_v51, %v3919_v23  ;;  %v3921_v37 = vsub.s32 1, %v3919_v23 }
  0xf9   : > { %2153 = vmatprep.subr.bf16.mxu0 %v3868_v35  ;;  %v297_v35 = vld [vmem:[%s3424_s21] sm:$0x3] }
  0xfb   : > { %1963 = vmatpush1.bf16.msra.mxu1 %v3871_v42 }
  0xfc   : > { %2155 = vmatpush1.bf16.msra.mxu0 %v3872_v32  ;;  %1965 = vmatprep.subr.bf16.mxu1 %v3875_v58  ;;  %v3920_v32 = vld [vmem:[#allocation59_spill] sm:$0xff] }
  0xfd   : > { %2157 = vmatprep.subr.bf16.mxu0 %v3876_v62 }
  0xff   : > { %1967 = vmatpush1.bf16.msra.mxu1 %v3879_v0 }
 0x100   : > { %2159 = vmatpush1.bf16.msra.mxu0 %v3880_v41  ;;  %1969 = vmatprep.subr.bf16.mxu1 %v3883_v53 }
 0x101   : > { %2161 = vmatprep.subr.bf16.mxu0 %v3884_v48 }
 0x103   : > { %1971 = vmatpush1.bf16.msra.mxu1 %v3887_v43 }
 0x104   : > { %2163 = vmatpush1.bf16.msra.mxu0 %v3888_v52  ;;  %1973 = vmatprep.subr.bf16.mxu1 %v3889_v57 }
 0x105   : > { %2165 = vmatprep.subr.bf16.mxu0 %v3890_v61 }
 0x107   : > { %1975 = vmatpush1.bf16.msra.mxu1 %v3891_v1 }
 0x108   : > { %2167 = vmatpush1.bf16.msra.mxu0 %v3892_v17  ;;  %1977 = vmatprep.subr.bf16.mxu1 %v3893_v4 }
 0x109   : > { %2169 = vmatprep.subr.bf16.mxu0 %v3894_v5 }
 0x10b   : > { %1979 = vmatpush1.bf16.msra.mxu1 %v3895_v56 }
 0x10c   : > { %2171 = vmatpush1.bf16.msra.mxu0 %v3896_v55  ;;  %1981 = vmatprep.subr.bf16.mxu1 %v3897_v2 }
 0x10d   : > { %2173 = vmatprep.subr.bf16.mxu0 %v3898_v54 }
 0x10f   : > { %1983 = vmatpush1.bf16.msra.mxu1 %v3899_v11 }
 0x110   : > { %2175 = vmatpush1.bf16.msra.mxu0 %v3900_v40  ;;  %1985 = vmatprep.subr.bf16.mxu1 %v3901_v6 }
 0x111   : > { %2177 = vmatprep.subr.bf16.mxu0 %v3902_v19 }
 0x113   : > { %1987 = vmatpush1.bf16.msra.mxu1 %v3903_v30 }
 0x114   : > { %2179 = vmatpush1.bf16.msra.mxu0 %v3904_v25  ;;  %1989 = vmatprep.subr.bf16.mxu1 %v3905_v24 }
 0x115   : > { %2181 = vmatprep.subr.bf16.mxu0 %v3906_v29 }
 0x117   : > { %1991 = vmatpush1.bf16.msra.mxu1 %v3907_v20 }
 0x118   : > { %2183 = vmatpush1.bf16.msra.mxu0 %v3908_v8  ;;  %1993 = vmatprep.subr.bf16.mxu1 %v3909_v13 }
 0x119   : > { %2185 = vmatprep.subr.bf16.mxu0 %v3910_v50 }
 0x11b   : > { %1995 = vmatpush1.bf16.msra.mxu1 %v3913_v47 }
 0x11c   : > { %2187 = vmatpush1.bf16.msra.mxu0 %v3914_v36 }
 0x11e   : > { %1044 = vmatmul.mubr.f32.vlgmr.msra.gmra.mrb[0].mxu1 %v3915_v39 }
 0x11f   : > { %1587 = vmatmul.mubr.f32.vlgmr.msra.gmra.mrb[0].mxu0 %v3830_v59 }
 0x1f1   : > { %v1045_v59 = vpop.f32.mrb[0].mxu1 }
 0x1f2   : > { %v1588_v9 = vpop.f32.mrb[0].mxu0  ;;  %v1047_v28 = vpop.f32.mrb[1].mxu1 }
 0x1f3   : > { %v2188_v7 = vadd.f32 %v1588_v9, %v1045_v59  ;;  %v1590_v3 = vpop.f32.mrb[1].mxu0 }
 0x1f4   : > { %v2189_v15 = vadd.f32 %v1590_v3, %v1047_v28 }
 0x1f6   : > { %v1595_v10 = vcombine.low %v2188_v7, %v2189_v15 }
 0x1f8   : > { %v1602_v31 = vrot.slane %v1595_v10, %v1601_v33 }
 0x1fa   : > { %v1609_v44 = vrot.slane %v1602_v31, %v1601_v33 }
 0x1fc   : > { %v1611_v46 = vadd.f32 %v1609_v44, %v297_v35 }
 0x1fe   : > { %1616 = vst.msk [vmem:[%s3424_s21] sm:$0x3] %vm3418_vm0, %v1611_v46 }
 0x205   : > { %v1620_v42 = vld [vmem:[%s3424_s21] sm:$0x3] }
 0x206   : > { %v1625_v60 = vrot.slane %v1620_v42, %v3920_v32  ;;  %v1629_v58 = vrot.slane %v1620_v42, %v3921_v37 }
 0x208   : > { %v1633_v62 = vsel %vm1632_vm1, %v1625_v60, -inf  ;;  %v1634_v14 = vsel %vm1632_vm1, %v1629_v58, -inf  ;;  %v1638_v0 = vsel %vm1632_vm1, %v1625_v60, inf  ;;  %v1639_v41 = vsel %vm1632_vm1, %v1629_v58, inf }
 0x209   : > { %v1635_v63 = vmax.f32 %v1633_v62, %v1634_v14  ;;  %v1640_v49 = vmin.f32 %v1638_v0, %v1639_v41 }
 0x20b   : > { %1636 = vmax.xlane.f32.xlu0 %v1635_v63 }
 0x20f   : > { %1641 = vmin.xlane.f32.xlu0 %v1640_v49 }
 0x298   : > { %v1637_v22 = vpop.xlane.xlu0 %1636 }
 0x29c   : > { %v1642_v53 = vpop.xlane.xlu0 %1641 }
 0x29d   : > { %v1643_v48 = vsub.f32 %v1637_v22, %v1642_v53  ;;  %v1649_v45 = vrot.slane %v1642_v53, %v3920_v32 }
 0x29f   : > { %2269 = vrcp.f32 %v1643_v48  ;;  %v1651_v43 = vsub.f32 %v1620_v42, %v1649_v45 }
 0x2a9   : > { %v2270_v18 = vpop.eup %2269 }
 0x2aa   : > { %v1656_v52 = vrot.slane %v2270_v18, %v3920_v32 }
 0x2ac   : > { %v1658_v57 = vmul.f32 %v1656_v52, %v1651_v43 }
 0x2ae   : > { %1659 = vst.msk [vmem:[%s3424_s21] sm:$0x3] %vm3418_vm0, %v1658_v57 }
 0x2af   : > { %2344 = shalt.err (!%p2341_p2)
}
 0x2b0   : > { %s2345_s4 = scalar_lea.hbm %s3445_s3, 32  ;;  %s2349_s26 = scalar_lea.hbm %s3499_s2, 64 }
 0x2b1   : > { %p2346_p9 = scmp.ne.s32.totalorder %s3445_s3, %s2345_s4  ;;  %p2350_p6 = scmp.lt.u32.totalorder %s3445_s3, %s3499_s2 }
 0x2b2   : > { %p2351_p4 = scmp.lt.u32.totalorder %s2349_s26, %s2345_s4  ;;  %p2353_p0 = scmp.lt.u32.totalorder %s2345_s4, %s3445_s3 }
 0x2b3   : > { %p2347_p11 = pnand %p2346_p9, %p3922_p5 }
 0x2b4   : > { %p2352_p8 = por %p2351_p4, %p2350_p6 }
 0x2b5   : > { %p2348_p3 = pneg %p2347_p11 }
 0x2b6   : > { %p2354_p7 = por %p2353_p0, %p2352_p8 }
 0x2b8   : > { %p2355_p13 = pnand %p2354_p7, %p2348_p3 }
 0x2ba   : > { %2358 = shalt.err (!%p2355_p13)
}
 0x2bb   : > { %2202 = dma.vmem_to_hbm [thread:$0]  (%p3922_p5), %s3447_s19, 32, %s3445_s3, %s1661_s7  }
 0x2bc PF: > { %s1687_s5 = sand.u32 1, %s2397_s9   ;;  %p3923_p10 = scmp.ne.s32.totalorder %s3648_s24, 0 }
 0x2bd   : > { %p3924_p12 = scmp.ge.s32.totalorder %s2417_s14, 2  ;;  %s1688_s29 = scalar_lea.sflag [#allocation4], %s1687_s5 }
 0x2bf   : > { %p2212_p1 = pnand %p3924_p12, %p3923_p10 }
 0x2c1   : > { %2392 = dma.done.wait (!%p2212_p1), %s1688_s29, 32  }
 0x2c2   : > { %2394 = vsyncadd (!%p2212_p1), %s1688_s29, 4294967264  ;;  %s21_s14 = sadd.s32 1, %s2417_s14   ;;  %s3925_s9 = smov %s2401_s10 }
 0x2c3   : > { %p18_p2 = scmp.ge.s32.totalorder %s21_s14, 4   ;;  %s3926_s10 = smov %s2405_s11 }
 0x2c4   : > { %s3927_s11 = smov %s2497_s23  ;;  %s3928_s12 = smov %s2413_s13 }
 0x2c5   : > { %s3929_s13 = smov %s3931_s17  ;;  %20 = sbr.rel (!%p18_p2) target bundleno = 8 (0x8), region = 94 }
 0x2cc   :  { %1693 = vsyncpa [#allocation3], 1 }
 0x2cd   :  { %1695 = vsyncpa [#allocation3 + $0x1], 1 }
 0x2ce   :  { %1696 = vsyncpa [#allocation6], 1 }
 0x2cf   :  { %1698 = vsyncpa [#allocation6 + $0x1], 1 }
 0x2d0   :  { %1699 = vsyncpa [#allocation4], 1 }
 0x2d1   :  { %1701 = vsyncpa [#allocation4 + $0x1], 1 }

</bundles_post_ra>
